<compile_context>
chip_gen: v6e
topology: v6e:2x2x1
jax: 0.10.0
libtpu: 0.0.40
codegen_flags: <defaults>
</compile_context>

<pallas_src>
import jax
import jax.numpy as jnp
from jax.experimental import pallas as pl
from jax.experimental.pallas import tpu as pltpu


def _round_up(n, m):
    return (n + m - 1) // m * m


# --------------------------------------------------------------------------
# Kernel: whole (fused) MLP forward on one batch tile; weights VMEM-resident.
# --------------------------------------------------------------------------
def mlp_kernel(x_ref,
               w01_ref, b01_ref,
               w2_ref, b2_ref,
               w3_ref, b3_ref,
               w4_ref, b4_ref,
               o_ref):
    f32 = jnp.float32
    bf16 = jnp.bfloat16

    # Fused Linear(5,50) @ Linear(50,100)  (exact fold: no activation between),
    # followed by the ReLU the Sequential applies after Linear(50,100).
    h = jnp.dot(x_ref[...], w01_ref[...], preferred_element_type=f32) + b01_ref[...]
    h = jnp.maximum(h, 0.0)

    # Linear(100,200) + ReLU  (bf16 x bf16 dot, f32 accumulate)
    h = jnp.dot(h.astype(bf16), w2_ref[...], preferred_element_type=f32) + b2_ref[...]
    h = jnp.maximum(h, 0.0)

    # Linear(200,400) + ReLU
    h = jnp.dot(h.astype(bf16), w3_ref[...], preferred_element_type=f32) + b3_ref[...]
    h = jnp.maximum(h, 0.0)

    # Linear(400,3) + Sigmoid
    logits = jnp.dot(h.astype(bf16), w4_ref[...], preferred_element_type=f32) + b4_ref[...]
    # sigmoid(x) == 0.5 * (tanh(x/2) + 1): tanh lands on the EUP, no VPU divide.
    o_ref[...] = 0.5 * (jnp.tanh(0.5 * logits) + 1.0)


# --------------------------------------------------------------------------
# Parameter init (PyTorch-style) and one-time fold / pad / bf16 cast.
# --------------------------------------------------------------------------
def init_params(key, input_dim=5, bump=10, hlayers=3, output_dim=3):
    """Deterministic PyTorch-style init: U(-1/sqrt(fan_in), 1/sqrt(fan_in))."""
    dims = [input_dim, input_dim * bump]
    current = input_dim * bump
    for i in range(hlayers):
        if i <= hlayers // 2 + 1:
            nxt = current * 2
        else:
            nxt = current // 2
        dims.append(nxt)
        current = nxt
    dims.append(output_dim)

    params = []
    for din, dout in zip(dims[:-1], dims[1:]):
        key, kw, kb = jax.random.split(key, 3)
        bound = 1.0 / jnp.sqrt(jnp.float32(din))
        w = jax.random.uniform(kw, (din, dout), jnp.float32, -bound, bound)
        b = jax.random.uniform(kb, (dout,), jnp.float32, -bound, bound)
        params.append((w, b))
    return params, dims


def prepare_padded_params(params, dims):
    """Done ONCE at init (hoisted out of the forward pass).

    * Folds Linear(5,50) into Linear(50,100) (no activation between them):
        W01 = W0 @ W1,  b01 = b0 @ W1 + b1   -- computed in f32 (exact).
    * Zero-pads weights to TPU-friendly shapes and casts them to bf16:
        out-feature (lane) dims -> multiple of 128; first in-feature dim -> 8;
        later in-feature dims equal the previous layer's padded lane width.
    * Biases stay f32, shaped (1, padded_out) for broadcasting in the kernel.
    """
    hi = jax.lax.Precision.HIGHEST
    (w0, b0), (w1, b1) = params[0], params[1]
    w01 = jnp.dot(w0, w1, precision=hi)                 # (5, 100)
    b01 = jnp.dot(b0, w1, precision=hi) + b1            # (100,)

    fused = [(w01, b01)] + list(params[2:])
    fused_dims = [dims[0]] + dims[2:]                   # [5, 100, 200, 400, 3]

    pouts = [_round_up(d, 128) for d in fused_dims[1:]]
    pins = [_round_up(fused_dims[0], 8)] + pouts[:-1]

    padded = []
    for (w, b), din, dout, pin, pout in zip(fused, fused_dims[:-1], fused_dims[1:],
                                            pins, pouts):
        wp = jnp.zeros((pin, pout), jnp.float32).at[:din, :dout].set(w)
        wp = wp.astype(jnp.bfloat16)
        bp = jnp.zeros((1, pout), jnp.float32).at[0, :dout].set(b)
        padded.append((wp, bp))
    return padded


# --------------------------------------------------------------------------
# Forward: pad/cast only x per call, one pallas_call with a batch grid.
# --------------------------------------------------------------------------
def linear_nn_forward(x, padded_params, dims, *, batch_tile=1024):
    batch, in_dim = x.shape
    assert in_dim == dims[0]

    pin0 = padded_params[0][0].shape[0]        # padded first-layer fan-in (8)
    pout_last = padded_params[-1][1].shape[1]  # padded output width (128)

    pbatch = _round_up(batch, 8)
    tb = min(batch_tile, pbatch)               # tb is a multiple of 8
    pbatch = _round_up(pbatch, tb)             # grid divides evenly
    # (For large batches pbatch // tb >= 2 automatically, so the "parallel"
    #  batch axis can be split across v7x's two TensorCores.)

    # Single cheap per-call op: pad batch rows + tiny feature dim, cast bf16.
    xp = jnp.pad(x.astype(jnp.float32),
                 ((0, pbatch - batch), (0, pin0 - in_dim))).astype(jnp.bfloat16)

    flat_args = [xp]
    for (w, b) in padded_params:
        flat_args += [w, b]

    flops = 2 * pbatch * sum(int(w.shape[0]) * int(w.shape[1])
                             for w, _ in padded_params)
    bytes_accessed = (xp.size * 2
                      + sum(w.size * 2 + b.size * 4 for w, b in padded_params)
                      + pbatch * pout_last * 4)

    def _build(weight_pipeline_mode):
        in_specs = [pl.BlockSpec((tb, pin0), lambda i: (i, 0))]
        for (w, b) in padded_params:
            kw = {}
            if weight_pipeline_mode is not None:
                kw["pipeline_mode"] = weight_pipeline_mode
            # Constant index_map: weights/biases fetched once, VMEM-resident.
            in_specs.append(pl.BlockSpec(w.shape, lambda i: (0, 0), **kw))
            in_specs.append(pl.BlockSpec(b.shape, lambda i: (0, 0), **kw))
        return pl.pallas_call(
            mlp_kernel,
            out_shape=jax.ShapeDtypeStruct((pbatch, pout_last), jnp.float32),
            grid=(pbatch // tb,),
            in_specs=in_specs,
            out_specs=pl.BlockSpec((tb, pout_last), lambda i: (i, 0)),
            compiler_params=pltpu.CompilerParams(
                dimension_semantics=("parallel",)),
            cost_estimate=pl.CostEstimate(
                flops=flops,
                transcendentals=pbatch * pout_last,
                bytes_accessed=bytes_accessed),
        )

    try:
        # Single-buffer the constant-index weight/bias operands.
        out_padded = _build(pl.Buffered(1))(*flat_args)
    except Exception:
        # Fallback if this jax build rejects pipeline_mode on these operands;
        # perf impact is negligible (weights are fetched once either way).
        out_padded = _build(None)(*flat_args)

    # Padded rows / columns never contaminate real outputs; slice them off.
    return out_padded[:batch, :dims[-1]]


if __name__ == "__main__":
    key = jax.random.PRNGKey(0)
    key, kparam, kx = jax.random.split(key, 3)

    params, dims = init_params(kparam, input_dim=5, bump=10, hlayers=3, output_dim=3)
    padded_params = prepare_padded_params(params, dims)   # hoisted, cached once

    batch = 2
    x = jax.random.normal(kx, (batch, dims[0]), jnp.float32)

    y = linear_nn_forward(x, padded_params, dims)
    y = jax.block_until_ready(y)

    # Pure-JAX f32 reference of the original (unfused, unpadded) network.
    def ref_forward(x, params):
        h = x @ params[0][0] + params[0][1]              # Linear(5,50), no act
        for w, b in params[1:-1]:
            h = jnp.maximum(h @ w + b, 0.0)              # Linear + ReLU
        w, b = params[-1]
        return jax.nn.sigmoid(h @ w + b)                 # Linear + Sigmoid

    y_ref = ref_forward(x, params)

    assert y.shape == (batch, dims[-1])
    assert bool(jnp.all(jnp.isfinite(y)))
    assert bool(jnp.all((y >= 0.0) & (y <= 1.0)))        # sigmoid output range
    # bf16 weights/activations -> loose absolute tolerance vs f32 reference.
    assert bool(jnp.allclose(y, y_ref, atol=5e-2, rtol=0.0))
    print("KERNEL_OK")
</pallas_src>

<mosaic_0001>
module attributes {stable_mosaic.version = 11 : i64} {
  func.func @mlp_kernel(%arg0: i32, %arg1: memref<8x8xbf16, #tpu.memory_space<vmem>>, %arg2: memref<8x128xbf16, #tpu.memory_space<vmem>>, %arg3: memref<1x128xf32, #tpu.memory_space<vmem>>, %arg4: memref<128x256xbf16, #tpu.memory_space<vmem>>, %arg5: memref<1x256xf32, #tpu.memory_space<vmem>>, %arg6: memref<256x512xbf16, #tpu.memory_space<vmem>>, %arg7: memref<1x512xf32, #tpu.memory_space<vmem>>, %arg8: memref<512x128xbf16, #tpu.memory_space<vmem>>, %arg9: memref<1x128xf32, #tpu.memory_space<vmem>>, %arg10: memref<8x128xf32, #tpu.memory_space<vmem>>) attributes {dimension_semantics = [#tpu.dimension_semantics<parallel>], iteration_bounds = array<i64: 1>, scalar_prefetch = 0 : i64, scratch_operands = 0 : i64, tpu.core_type = #tpu.core_type<tc>, window_params = [{transform_indices = @transform_0, window_bounds = array<i64: 8, 8>}, {pipeline_mode = #tpu.pipeline_mode<synchronous>, transform_indices = @transform_1, window_bounds = array<i64: 8, 128>}, {pipeline_mode = #tpu.pipeline_mode<synchronous>, transform_indices = @transform_2, window_bounds = array<i64: 1, 128>}, {pipeline_mode = #tpu.pipeline_mode<synchronous>, transform_indices = @transform_3, window_bounds = array<i64: 128, 256>}, {pipeline_mode = #tpu.pipeline_mode<synchronous>, transform_indices = @transform_4, window_bounds = array<i64: 1, 256>}, {pipeline_mode = #tpu.pipeline_mode<synchronous>, transform_indices = @transform_5, window_bounds = array<i64: 256, 512>}, {pipeline_mode = #tpu.pipeline_mode<synchronous>, transform_indices = @transform_6, window_bounds = array<i64: 1, 512>}, {pipeline_mode = #tpu.pipeline_mode<synchronous>, transform_indices = @transform_7, window_bounds = array<i64: 512, 128>}, {pipeline_mode = #tpu.pipeline_mode<synchronous>, transform_indices = @transform_8, window_bounds = array<i64: 1, 128>}, {transform_indices = @transform_9, window_bounds = array<i64: 8, 128>}]} {
    %c0 = arith.constant 0 : index
    %c0_0 = arith.constant 0 : index
    %0 = vector.load %arg1[%c0, %c0_0] : memref<8x8xbf16, #tpu.memory_space<vmem>>, vector<8x8xbf16>
    %c0_1 = arith.constant 0 : index
    %c0_2 = arith.constant 0 : index
    %1 = vector.load %arg2[%c0_1, %c0_2] : memref<8x128xbf16, #tpu.memory_space<vmem>>, vector<8x128xbf16>
    %cst = arith.constant dense<0.000000e+00> : vector<8x128xf32>
    %2 = tpu.matmul %0, %1, %cst {dimension_numbers = #tpu.dot_dimension_numbers<[1], [0], [0], [1], [0, 0, 1, 1], [], []>} : vector<8x8xbf16>, vector<8x128xbf16>, vector<8x128xf32> -> vector<8x128xf32>
    %c0_3 = arith.constant 0 : index
    %c0_4 = arith.constant 0 : index
    %3 = vector.load %arg3[%c0_3, %c0_4] : memref<1x128xf32, #tpu.memory_space<vmem>>, vector<1x128xf32>
    %4 = vector.broadcast %3 : vector<1x128xf32> to vector<8x128xf32>
    %5 = arith.addf %2, %4 : vector<8x128xf32>
    %cst_5 = arith.constant 0.000000e+00 : f32
    %6 = vector.broadcast %cst_5 : f32 to vector<8x128xf32>
    %7 = arith.maximumf %5, %6 : vector<8x128xf32>
    %8 = arith.truncf %7 : vector<8x128xf32> to vector<8x128xbf16>
    %c0_6 = arith.constant 0 : index
    %c0_7 = arith.constant 0 : index
    %9 = vector.load %arg4[%c0_6, %c0_7] : memref<128x256xbf16, #tpu.memory_space<vmem>>, vector<128x256xbf16>
    %cst_8 = arith.constant dense<0.000000e+00> : vector<8x256xf32>
    %10 = tpu.matmul %8, %9, %cst_8 {dimension_numbers = #tpu.dot_dimension_numbers<[1], [0], [0], [1], [0, 0, 1, 1], [], []>} : vector<8x128xbf16>, vector<128x256xbf16>, vector<8x256xf32> -> vector<8x256xf32>
    %c0_9 = arith.constant 0 : index
    %c0_10 = arith.constant 0 : index
    %11 = vector.load %arg5[%c0_9, %c0_10] : memref<1x256xf32, #tpu.memory_space<vmem>>, vector<1x256xf32>
    %12 = vector.broadcast %11 : vector<1x256xf32> to vector<8x256xf32>
    %13 = arith.addf %10, %12 : vector<8x256xf32>
    %cst_11 = arith.constant 0.000000e+00 : f32
    %14 = vector.broadcast %cst_11 : f32 to vector<8x256xf32>
    %15 = arith.maximumf %13, %14 : vector<8x256xf32>
    %16 = arith.truncf %15 : vector<8x256xf32> to vector<8x256xbf16>
    %c0_12 = arith.constant 0 : index
    %c0_13 = arith.constant 0 : index
    %17 = vector.load %arg6[%c0_12, %c0_13] : memref<256x512xbf16, #tpu.memory_space<vmem>>, vector<256x512xbf16>
    %cst_14 = arith.constant dense<0.000000e+00> : vector<8x512xf32>
    %18 = tpu.matmul %16, %17, %cst_14 {dimension_numbers = #tpu.dot_dimension_numbers<[1], [0], [0], [1], [0, 0, 1, 1], [], []>} : vector<8x256xbf16>, vector<256x512xbf16>, vector<8x512xf32> -> vector<8x512xf32>
    %c0_15 = arith.constant 0 : index
    %c0_16 = arith.constant 0 : index
    %19 = vector.load %arg7[%c0_15, %c0_16] : memref<1x512xf32, #tpu.memory_space<vmem>>, vector<1x512xf32>
    %20 = vector.broadcast %19 : vector<1x512xf32> to vector<8x512xf32>
    %21 = arith.addf %18, %20 : vector<8x512xf32>
    %cst_17 = arith.constant 0.000000e+00 : f32
    %22 = vector.broadcast %cst_17 : f32 to vector<8x512xf32>
    %23 = arith.maximumf %21, %22 : vector<8x512xf32>
    %24 = arith.truncf %23 : vector<8x512xf32> to vector<8x512xbf16>
    %c0_18 = arith.constant 0 : index
    %c0_19 = arith.constant 0 : index
    %25 = vector.load %arg8[%c0_18, %c0_19] : memref<512x128xbf16, #tpu.memory_space<vmem>>, vector<512x128xbf16>
    %cst_20 = arith.constant dense<0.000000e+00> : vector<8x128xf32>
    %26 = tpu.matmul %24, %25, %cst_20 {dimension_numbers = #tpu.dot_dimension_numbers<[1], [0], [0], [1], [0, 0, 1, 1], [], []>} : vector<8x512xbf16>, vector<512x128xbf16>, vector<8x128xf32> -> vector<8x128xf32>
    %c0_21 = arith.constant 0 : index
    %c0_22 = arith.constant 0 : index
    %27 = vector.load %arg9[%c0_21, %c0_22] : memref<1x128xf32, #tpu.memory_space<vmem>>, vector<1x128xf32>
    %28 = vector.broadcast %27 : vector<1x128xf32> to vector<8x128xf32>
    %29 = arith.addf %26, %28 : vector<8x128xf32>
    %cst_23 = arith.constant 5.000000e-01 : f32
    %30 = vector.broadcast %cst_23 : f32 to vector<8x128xf32>
    %31 = arith.mulf %30, %29 : vector<8x128xf32>
    %32 = math.tanh %31 : vector<8x128xf32>
    %cst_24 = arith.constant 1.000000e+00 : f32
    %33 = vector.broadcast %cst_24 : f32 to vector<8x128xf32>
    %34 = arith.addf %32, %33 : vector<8x128xf32>
    %cst_25 = arith.constant 5.000000e-01 : f32
    %35 = vector.broadcast %cst_25 : f32 to vector<8x128xf32>
    %36 = arith.mulf %35, %34 : vector<8x128xf32>
    %c0_26 = arith.constant 0 : index
    %c0_27 = arith.constant 0 : index
    %37 = vector.load %arg10[%c0_26, %c0_27] : memref<8x128xf32, #tpu.memory_space<vmem>>, vector<8x128xf32>
    tpu.vector_store %arg10[%c0_26, %c0_27], %36 {strides = array<i32>} : memref<8x128xf32, #tpu.memory_space<vmem>>, vector<8x128xf32>,
    return
  }
  func.func @transform_0(%arg0: i32) -> (i32, i32) {
    %c0_i32 = arith.constant 0 : i32
    %c0_i32_0 = arith.constant 0 : i32
    return %arg0, %c0_i32 : i32, i32
  }
  func.func @transform_1(%arg0: i32) -> (i32, i32) {
    %c0_i32 = arith.constant 0 : i32
    %c0_i32_0 = arith.constant 0 : i32
    %c0_i32_1 = arith.constant 0 : i32
    return %c0_i32, %c0_i32_0 : i32, i32
  }
  func.func @transform_2(%arg0: i32) -> (i32, i32) {
    %c0_i32 = arith.constant 0 : i32
    %c0_i32_0 = arith.constant 0 : i32
    %c0_i32_1 = arith.constant 0 : i32
    return %c0_i32, %c0_i32_0 : i32, i32
  }
  func.func @transform_3(%arg0: i32) -> (i32, i32) {
    %c0_i32 = arith.constant 0 : i32
    %c0_i32_0 = arith.constant 0 : i32
    %c0_i32_1 = arith.constant 0 : i32
    return %c0_i32, %c0_i32_0 : i32, i32
  }
  func.func @transform_4(%arg0: i32) -> (i32, i32) {
    %c0_i32 = arith.constant 0 : i32
    %c0_i32_0 = arith.constant 0 : i32
    %c0_i32_1 = arith.constant 0 : i32
    return %c0_i32, %c0_i32_0 : i32, i32
  }
  func.func @transform_5(%arg0: i32) -> (i32, i32) {
    %c0_i32 = arith.constant 0 : i32
    %c0_i32_0 = arith.constant 0 : i32
    %c0_i32_1 = arith.constant 0 : i32
    return %c0_i32, %c0_i32_0 : i32, i32
  }
  func.func @transform_6(%arg0: i32) -> (i32, i32) {
    %c0_i32 = arith.constant 0 : i32
    %c0_i32_0 = arith.constant 0 : i32
    %c0_i32_1 = arith.constant 0 : i32
    return %c0_i32, %c0_i32_0 : i32, i32
  }
  func.func @transform_7(%arg0: i32) -> (i32, i32) {
    %c0_i32 = arith.constant 0 : i32
    %c0_i32_0 = arith.constant 0 : i32
    %c0_i32_1 = arith.constant 0 : i32
    return %c0_i32, %c0_i32_0 : i32, i32
  }
  func.func @transform_8(%arg0: i32) -> (i32, i32) {
    %c0_i32 = arith.constant 0 : i32
    %c0_i32_0 = arith.constant 0 : i32
    %c0_i32_1 = arith.constant 0 : i32
    return %c0_i32, %c0_i32_0 : i32, i32
  }
  func.func @transform_9(%arg0: i32) -> (i32, i32) {
    %c0_i32 = arith.constant 0 : i32
    %c0_i32_0 = arith.constant 0 : i32
    return %arg0, %c0_i32 : i32, i32
  }
}

module attributes {stable_mosaic.version = 11 : i64} {
  func.func @mlp_kernel(%arg0: i32, %arg1: memref<8x8xbf16, #tpu.memory_space<vmem>>, %arg2: memref<8x128xbf16, #tpu.memory_space<vmem>>, %arg3: memref<1x128xf32, #tpu.memory_space<vmem>>, %arg4: memref<128x256xbf16, #tpu.memory_space<vmem>>, %arg5: memref<1x256xf32, #tpu.memory_space<vmem>>, %arg6: memref<256x512xbf16, #tpu.memory_space<vmem>>, %arg7: memref<1x512xf32, #tpu.memory_space<vmem>>, %arg8: memref<512x128xbf16, #tpu.memory_space<vmem>>, %arg9: memref<1x128xf32, #tpu.memory_space<vmem>>, %arg10: memref<8x128xf32, #tpu.memory_space<vmem>>) attributes {dimension_semantics = [#tpu.dimension_semantics<parallel>], iteration_bounds = array<i64: 1>, scalar_prefetch = 0 : i64, scratch_operands = 0 : i64, tpu.core_type = #tpu.core_type<tc>, window_params = [{transform_indices = @transform_0, window_bounds = array<i64: 8, 8>}, {pipeline_mode = #tpu.pipeline_mode<synchronous>, transform_indices = @transform_1, window_bounds = array<i64: 8, 128>}, {pipeline_mode = #tpu.pipeline_mode<synchronous>, transform_indices = @transform_2, window_bounds = array<i64: 1, 128>}, {pipeline_mode = #tpu.pipeline_mode<synchronous>, transform_indices = @transform_3, window_bounds = array<i64: 128, 256>}, {pipeline_mode = #tpu.pipeline_mode<synchronous>, transform_indices = @transform_4, window_bounds = array<i64: 1, 256>}, {pipeline_mode = #tpu.pipeline_mode<synchronous>, transform_indices = @transform_5, window_bounds = array<i64: 256, 512>}, {pipeline_mode = #tpu.pipeline_mode<synchronous>, transform_indices = @transform_6, window_bounds = array<i64: 1, 512>}, {pipeline_mode = #tpu.pipeline_mode<synchronous>, transform_indices = @transform_7, window_bounds = array<i64: 512, 128>}, {pipeline_mode = #tpu.pipeline_mode<synchronous>, transform_indices = @transform_8, window_bounds = array<i64: 1, 128>}, {transform_indices = @transform_9, window_bounds = array<i64: 8, 128>}]} {
    %c0 = arith.constant 0 : index
    %c0_0 = arith.constant 0 : index
    %0 = vector.load %arg1[%c0, %c0_0] : memref<8x8xbf16, #tpu.memory_space<vmem>>, vector<8x8xbf16>
    %c0_1 = arith.constant 0 : index
    %c0_2 = arith.constant 0 : index
    %1 = vector.load %arg2[%c0_1, %c0_2] : memref<8x128xbf16, #tpu.memory_space<vmem>>, vector<8x128xbf16>
    %cst = arith.constant dense<0.000000e+00> : vector<8x128xf32>
    %2 = tpu.matmul %0, %1, %cst {dimension_numbers = #tpu.dot_dimension_numbers<[1], [0], [0], [1], [0, 0, 1, 1], [], []>} : vector<8x8xbf16>, vector<8x128xbf16>, vector<8x128xf32> -> vector<8x128xf32>
    %c0_3 = arith.constant 0 : index
    %c0_4 = arith.constant 0 : index
    %3 = vector.load %arg3[%c0_3, %c0_4] : memref<1x128xf32, #tpu.memory_space<vmem>>, vector<1x128xf32>
    %4 = vector.broadcast %3 : vector<1x128xf32> to vector<8x128xf32>
    %5 = arith.addf %2, %4 : vector<8x128xf32>
    %cst_5 = arith.constant 0.000000e+00 : f32
    %6 = vector.broadcast %cst_5 : f32 to vector<8x128xf32>
    %7 = arith.maximumf %5, %6 : vector<8x128xf32>
    %8 = arith.truncf %7 : vector<8x128xf32> to vector<8x128xbf16>
    %c0_6 = arith.constant 0 : index
    %c0_7 = arith.constant 0 : index
    %9 = vector.load %arg4[%c0_6, %c0_7] : memref<128x256xbf16, #tpu.memory_space<vmem>>, vector<128x256xbf16>
    %cst_8 = arith.constant dense<0.000000e+00> : vector<8x256xf32>
    %10 = tpu.matmul %8, %9, %cst_8 {dimension_numbers = #tpu.dot_dimension_numbers<[1], [0], [0], [1], [0, 0, 1, 1], [], []>} : vector<8x128xbf16>, vector<128x256xbf16>, vector<8x256xf32> -> vector<8x256xf32>
    %c0_9 = arith.constant 0 : index
    %c0_10 = arith.constant 0 : index
    %11 = vector.load %arg5[%c0_9, %c0_10] : memref<1x256xf32, #tpu.memory_space<vmem>>, vector<1x256xf32>
    %12 = vector.broadcast %11 : vector<1x256xf32> to vector<8x256xf32>
    %13 = arith.addf %10, %12 : vector<8x256xf32>
    %cst_11 = arith.constant 0.000000e+00 : f32
    %14 = vector.broadcast %cst_11 : f32 to vector<8x256xf32>
    %15 = arith.maximumf %13, %14 : vector<8x256xf32>
    %16 = arith.truncf %15 : vector<8x256xf32> to vector<8x256xbf16>
    %c0_12 = arith.constant 0 : index
    %c0_13 = arith.constant 0 : index
    %17 = vector.load %arg6[%c0_12, %c0_13] : memref<256x512xbf16, #tpu.memory_space<vmem>>, vector<256x512xbf16>
    %cst_14 = arith.constant dense<0.000000e+00> : vector<8x512xf32>
    %18 = tpu.matmul %16, %17, %cst_14 {dimension_numbers = #tpu.dot_dimension_numbers<[1], [0], [0], [1], [0, 0, 1, 1], [], []>} : vector<8x256xbf16>, vector<256x512xbf16>, vector<8x512xf32> -> vector<8x512xf32>
    %c0_15 = arith.constant 0 : index
    %c0_16 = arith.constant 0 : index
    %19 = vector.load %arg7[%c0_15, %c0_16] : memref<1x512xf32, #tpu.memory_space<vmem>>, vector<1x512xf32>
    %20 = vector.broadcast %19 : vector<1x512xf32> to vector<8x512xf32>
    %21 = arith.addf %18, %20 : vector<8x512xf32>
    %cst_17 = arith.constant 0.000000e+00 : f32
    %22 = vector.broadcast %cst_17 : f32 to vector<8x512xf32>
    %23 = arith.maximumf %21, %22 : vector<8x512xf32>
    %24 = arith.truncf %23 : vector<8x512xf32> to vector<8x512xbf16>
    %c0_18 = arith.constant 0 : index
    %c0_19 = arith.constant 0 : index
    %25 = vector.load %arg8[%c0_18, %c0_19] : memref<512x128xbf16, #tpu.memory_space<vmem>>, vector<512x128xbf16>
    %cst_20 = arith.constant dense<0.000000e+00> : vector<8x128xf32>
    %26 = tpu.matmul %24, %25, %cst_20 {dimension_numbers = #tpu.dot_dimension_numbers<[1], [0], [0], [1], [0, 0, 1, 1], [], []>} : vector<8x512xbf16>, vector<512x128xbf16>, vector<8x128xf32> -> vector<8x128xf32>
    %c0_21 = arith.constant 0 : index
    %c0_22 = arith.constant 0 : index
    %27 = vector.load %arg9[%c0_21, %c0_22] : memref<1x128xf32, #tpu.memory_space<vmem>>, vector<1x128xf32>
    %28 = vector.broadcast %27 : vector<1x128xf32> to vector<8x128xf32>
    %29 = arith.addf %26, %28 : vector<8x128xf32>
    %cst_23 = arith.constant 5.000000e-01 : f32
    %30 = vector.broadcast %cst_23 : f32 to vector<8x128xf32>
    %31 = arith.mulf %30, %29 : vector<8x128xf32>
    %32 = math.tanh %31 : vector<8x128xf32>
    %cst_24 = arith.constant 1.000000e+00 : f32
    %33 = vector.broadcast %cst_24 : f32 to vector<8x128xf32>
    %34 = arith.addf %32, %33 : vector<8x128xf32>
    %cst_25 = arith.constant 5.000000e-01 : f32
    %35 = vector.broadcast %cst_25 : f32 to vector<8x128xf32>
    %36 = arith.mulf %35, %34 : vector<8x128xf32>
    %c0_26 = arith.constant 0 : index
    %c0_27 = arith.constant 0 : index
    %37 = vector.load %arg10[%c0_26, %c0_27] : memref<8x128xf32, #tpu.memory_space<vmem>>, vector<8x128xf32>
    tpu.vector_store %arg10[%c0_26, %c0_27], %36 {strides = array<i32>} : memref<8x128xf32, #tpu.memory_space<vmem>>, vector<8x128xf32>,
    return
  }
  func.func @transform_0(%arg0: i32) -> (i32, i32) {
    %c0_i32 = arith.constant 0 : i32
    %c0_i32_0 = arith.constant 0 : i32
    return %arg0, %c0_i32 : i32, i32
  }
  func.func @transform_1(%arg0: i32) -> (i32, i32) {
    %c0_i32 = arith.constant 0 : i32
    %c0_i32_0 = arith.constant 0 : i32
    %c0_i32_1 = arith.constant 0 : i32
    return %c0_i32, %c0_i32_0 : i32, i32
  }
  func.func @transform_2(%arg0: i32) -> (i32, i32) {
    %c0_i32 = arith.constant 0 : i32
    %c0_i32_0 = arith.constant 0 : i32
    %c0_i32_1 = arith.constant 0 : i32
    return %c0_i32, %c0_i32_0 : i32, i32
  }
  func.func @transform_3(%arg0: i32) -> (i32, i32) {
    %c0_i32 = arith.constant 0 : i32
    %c0_i32_0 = arith.constant 0 : i32
    %c0_i32_1 = arith.constant 0 : i32
    return %c0_i32, %c0_i32_0 : i32, i32
  }
  func.func @transform_4(%arg0: i32) -> (i32, i32) {
    %c0_i32 = arith.constant 0 : i32
    %c0_i32_0 = arith.constant 0 : i32
    %c0_i32_1 = arith.constant 0 : i32
    return %c0_i32, %c0_i32_0 : i32, i32
  }
  func.func @transform_5(%arg0: i32) -> (i32, i32) {
    %c0_i32 = arith.constant 0 : i32
    %c0_i32_0 = arith.constant 0 : i32
    %c0_i32_1 = arith.constant 0 : i32
    return %c0_i32, %c0_i32_0 : i32, i32
  }
  func.func @transform_6(%arg0: i32) -> (i32, i32) {
    %c0_i32 = arith.constant 0 : i32
    %c0_i32_0 = arith.constant 0 : i32
    %c0_i32_1 = arith.constant 0 : i32
    return %c0_i32, %c0_i32_0 : i32, i32
  }
  func.func @transform_7(%arg0: i32) -> (i32, i32) {
    %c0_i32 = arith.constant 0 : i32
    %c0_i32_0 = arith.constant 0 : i32
    %c0_i32_1 = arith.constant 0 : i32
    return %c0_i32, %c0_i32_0 : i32, i32
  }
  func.func @transform_8(%arg0: i32) -> (i32, i32) {
    %c0_i32 = arith.constant 0 : i32
    %c0_i32_0 = arith.constant 0 : i32
    %c0_i32_1 = arith.constant 0 : i32
    return %c0_i32, %c0_i32_0 : i32, i32
  }
  func.func @transform_9(%arg0: i32) -> (i32, i32) {
    %c0_i32 = arith.constant 0 : i32
    %c0_i32_0 = arith.constant 0 : i32
    return %arg0, %c0_i32 : i32, i32
  }
}

</mosaic_0001>

<bundles_post_ra>
// kernel: tpu_custom_call.1
= control target key start
LH: loop header
LB: loop body
LE: loop exit
PB: predicated region body
PF: predicated region fallthrough
CT: control target
= control target key end

     0   :  { %14 = vsyncpa [#allocation3], 0  ;;  %s1744_s0 = inlined_call_operand.hbm [shape: bf16[8,8], index: 0, kind: input, shape index: {}]   ;;  %s1745_s1 = inlined_call_operand.hbm [shape: bf16[8,128], index: 1, kind: input, shape index: {}]   ;;  %s1746_s2 = inlined_call_operand.vmem [shape: f32[1,128], index: 2, kind: input, shape index: {}]   ;;  %s1747_s3 = inlined_call_operand.hbm [shape: bf16[128,256], index: 3, kind: input, shape index: {}]   ;;  %s1748_s4 = inlined_call_operand.vmem [shape: f32[1,256], index: 4, kind: input, shape index: {}]   ;;  %s1749_s5 = inlined_call_operand.hbm [shape: bf16[256,512], index: 5, kind: input, shape index: {}]   ;;  %s1750_s6 = inlined_call_operand.vmem [shape: f32[1,512], index: 6, kind: input, shape index: {}]   ;;  %s1751_s7 = inlined_call_operand.hbm [shape: bf16[512,128], index: 7, kind: input, shape index: {}]   ;;  %s1752_s8 = inlined_call_operand.vmem [shape: f32[1,128], index: 8, kind: input, shape index: {}]   ;;  %s1753_s9 = inlined_call_operand.hbm [shape: f32[8,128], index: 9, kind: output, shape index: {}]  }
   0x1   :  { %15 = vsyncpa [#allocation6], 0 }
   0x2   :  { %16 = vsyncpa [#allocation9], 0 }
   0x3   :  { %17 = vsyncpa [#allocation4], 0  ;;  %s1635_s30 = smov [#allocation5]   ;;  %s1636_s11 = smov [#allocation8]  }
   0x4   :  { %s34_s10 = sshll.u32 %s1635_s30, 4  ;;  %s59_s12 = sshll.u32 %s1636_s11, 4  ;;  %s35_s10 = int_to_ptr.vmem [resolvable:$true] %s34_s10  ;;  %s60_s12 = int_to_ptr.vmem [resolvable:$true] %s59_s12 }
   0x5   :  { %s1515_s13 = scalar_lea.vmem %s35_s10, 64  ;;  %p1520_p1 = scmp.lt.s32.totalorder %s35_s10, %s35_s10 }
   0x6   :  { %p1516_p0 = scmp.ne.s32.totalorder %s35_s10, %s1515_s13  ;;  %p1521_p2 = scmp.lt.s32.totalorder %s1515_s13, %s1515_s13 }
   0x8   :  { %p1522_p3 = por %p1521_p2, %p1520_p1 }
   0xa   :  { %p1523_p4 = pnand %p1522_p3, %p1516_p0 }
   0xc   :  { %1526 = shalt.err (!%p1523_p4)
}
   0xd   :  { %37 = dma.hbm_to_vmem [thread:$0]  %s1745_s1, 64, %s35_s10, [#allocation6]  }
   0xe   :  { %s1535_s16 = scalar_lea.vmem %s60_s12, 8192  ;;  %p1540_p6 = scmp.lt.s32.totalorder %s60_s12, %s60_s12 }
   0xf   :  { %p1536_p5 = scmp.ne.s32.totalorder %s60_s12, %s1535_s16  ;;  %p1541_p7 = scmp.lt.s32.totalorder %s1535_s16, %s1535_s16 }
  0x11   :  { %p1542_p8 = por %p1541_p7, %p1540_p6 }
  0x13   :  { %p1543_p9 = pnand %p1542_p8, %p1536_p5 }
  0x15   :  { %1546 = shalt.err (!%p1543_p9)
}
  0x16   :  { %s1637_s17 = smov 256   ;;  %s1638_s18 = smov 16  }
  0x17   :  { %65 = dma.hbm_to_vmem [thread:$0]  %s1749_s5, 8192, %s60_s12, [#allocation9], %s1637_s17, %s1637_s17, %s1638_s18  }
  0x18   :  { %s1639_s21 = smov [#allocation2]   ;;  %s1640_s23 = smov [#allocation7]  }
  0x19   :  { %s24_s22 = sshll.u32 %s1639_s21, 4  ;;  %s45_s24 = sshll.u32 %s1640_s23, 4  ;;  %s25_s22 = int_to_ptr.vmem [resolvable:$true] %s24_s22  ;;  %s46_s24 = int_to_ptr.vmem [resolvable:$true] %s45_s24 }
  0x1a   :  { %s1555_s1 = scalar_lea.vmem %s25_s22, 64  ;;  %p1560_p11 = scmp.lt.s32.totalorder %s25_s22, %s25_s22 }
  0x1b   :  { %p1556_p10 = scmp.ne.s32.totalorder %s25_s22, %s1555_s1  ;;  %p1561_p12 = scmp.lt.s32.totalorder %s1555_s1, %s1555_s1 }
  0x1d   :  { %p1562_p13 = por %p1561_p12, %p1560_p11 }
  0x1f   :  { %p1563_p0 = pnand %p1562_p13, %p1556_p10 }
  0x21   :  { %1566 = shalt.err (!%p1563_p0)
}
  0x22   :  { %27 = dma.hbm_to_vmem [thread:$0]  %s1744_s0, 64, %s25_s22, [#allocation3]  }
  0x23   :  { %s1575_s27 = scalar_lea.vmem %s46_s24, 2048  ;;  %p1580_p2 = scmp.lt.s32.totalorder %s46_s24, %s46_s24 }
  0x24   :  { %p1576_p1 = scmp.ne.s32.totalorder %s46_s24, %s1575_s27  ;;  %p1581_p3 = scmp.lt.s32.totalorder %s1575_s27, %s1575_s27 }
  0x26   :  { %p1582_p4 = por %p1581_p3, %p1580_p2 }
  0x28   :  { %p1583_p5 = pnand %p1582_p4, %p1576_p1 }
  0x2a   :  { %1586 = shalt.err (!%p1583_p5)
}
  0x2b   :  { %s1641_s5 = smov 128   ;;  %s1642_s28 = smov 8  }
  0x2c   :  { %51 = dma.hbm_to_vmem [thread:$0]  %s1747_s3, 2048, %s46_s24, [#allocation6], %s1641_s5, %s1641_s5, %s1642_s28  }
  0x2d   :  { %s1643_s10 = smov [#allocation10]  }
  0x2e   :  { %s73_s11 = sshll.u32 %s1643_s10, 4  ;;  %s74_s11 = int_to_ptr.vmem [resolvable:$true] %s73_s11 }
  0x2f   :  { %s1595_s12 = scalar_lea.vmem %s74_s11, 4096  ;;  %p1600_p7 = scmp.lt.s32.totalorder %s74_s11, %s74_s11 }
  0x30   :  { %p1596_p6 = scmp.ne.s32.totalorder %s74_s11, %s1595_s12  ;;  %p1601_p8 = scmp.lt.s32.totalorder %s1595_s12, %s1595_s12 }
  0x32   :  { %p1602_p9 = por %p1601_p8, %p1600_p7 }
  0x34   :  { %p1603_p10 = pnand %p1602_p9, %p1596_p6 }
  0x36   :  { %1606 = shalt.err (!%p1603_p10)
}
  0x37   :  { %s1644_s0 = smov 64   ;;  %s1645_s13 = smov 4  }
  0x38   :  { %79 = dma.hbm_to_vmem [thread:$0]  %s1751_s7, 4096, %s74_s11, [#allocation9], %s1644_s0, %s1644_s0, %s1645_s13  }
  0x39   :  { %1627 = dma.done.wait [#allocation3], 64  }
  0x3a   :  { %1628 = vsyncadd [#allocation3], 4294967232 }
  0x3b   :  { %1629 = dma.done.wait [#allocation6], 2112  }
  0x3c   :  { %1630 = vsyncadd [#allocation6], 4294965184 }
  0x3d   :  { %1631 = dma.done.wait [#allocation9], 12288  }
  0x3e   :  { %1632 = vsyncadd [#allocation9], 4294955008  ;;  %v1646_v0 = vmov 0.0   ;;  %vm1647_vm0 = vmmov 0   ;;  %vm111_vm1 = vcmask 1043456   ;;  %vm107_vm2 = vcmask 64512  }
  0x3f   :  { %1332 = vmatprep.subr.bf16.mxu0 %v1646_v0  ;;  %1334 = vmatprep.mubr.msk.bf16.mxu0 %vm1647_vm0, %v1646_v0  ;;  %v99_v1 = vld [vmem:[#allocation5] sm:$0xf]  ;;  %v98_v2 = vld [vmem:[#allocation2] sm:$0xf]  ;;  %v1356_v6 = vld [vmem:[#allocation7 + $0x64] ss:$8 sps:$4 sm:$0xff]  }
  0x40   :  { %v113_v3 = vsel %vm111_vm1, %v99_v1, 0  ;;  %v1353_v4 = vld [vmem:[#allocation7 + $0x74] ss:$8 sps:$4 sm:$0xff]   ;;  %v1355_v5 = vld [vmem:[#allocation7 + $0x70] ss:$8 sps:$4 sm:$0xff]   ;;  %v1648_v20 = vmov 0  }
  0x41   :  { %1333 = vmatpush3.bf16.msra.mxu0 %v113_v3  ;;  %265 = vmatprep.subr.bf16.mxu1 %v1353_v4  ;;  %v1358_v7 = vld [vmem:[#allocation7 + $0x60] ss:$8 sps:$4 sm:$0xff]   ;;  %v1359_v8 = vld [vmem:[#allocation7 + $0x54] ss:$8 sps:$4 sm:$0xff]   ;;  %v1361_v9 = vld [vmem:[#allocation7 + $0x50] ss:$8 sps:$4 sm:$0xff]  }
  0x42   :  { %266 = vmatpush1.bf16.msra.mxu1 %v1355_v5  ;;  %v1362_v10 = vld [vmem:[#allocation7 + $0x44] ss:$8 sps:$4 sm:$0xff]   ;;  %v1364_v11 = vld [vmem:[#allocation7 + $0x40] ss:$8 sps:$4 sm:$0xff]   ;;  %v1365_v12 = vld [vmem:[#allocation7 + $0x34] ss:$8 sps:$4 sm:$0xff]   ;;  %297 = vmatprep.mubr.bf16.mxu1 %v1648_v20 }
  0x43   :  { %267 = vmatprep.subr.bf16.mxu1 %v1356_v6  ;;  %v1367_v13 = vld [vmem:[#allocation7 + $0x30] ss:$8 sps:$4 sm:$0xff]   ;;  %v1368_v14 = vld [vmem:[#allocation7 + $0x24] ss:$8 sps:$4 sm:$0xff]   ;;  %v1370_v15 = vld [vmem:[#allocation7 + $0x20] ss:$8 sps:$4 sm:$0xff]  }
  0x44   :  { %1335 = vmatmul.mubr.msk.bf16.vlgmr.msra.gmra.mxu0 %vm107_vm2, %v98_v2  ;;  %v1371_v16 = vld [vmem:[#allocation7 + $0x14] ss:$8 sps:$4 sm:$0xff]   ;;  %v1373_v17 = vld [vmem:[#allocation7 + $0x10] ss:$8 sps:$4 sm:$0xff]   ;;  %v1374_v18 = vld [vmem:[#allocation7 + $0x4] ss:$8 sps:$4 sm:$0xff]  }
  0x45   :  { %v1376_v19 = vld [vmem:[#allocation7] ss:$8 sps:$4 sm:$0xff]   ;;  %v1379_v22 = vld [vmem:[#allocation8 + $0xe4] ss:$16 sps:$4 sm:$0xff]   ;;  %v1382_v23 = vld [vmem:[#allocation8 + $0xec] ss:$16 sps:$4 sm:$0xff]  }
  0x46   :  { %268 = vmatpush1.bf16.msra.mxu1 %v1358_v7  ;;  %v1377_v21 = vld [vmem:[#allocation8 + $0xe0] ss:$16 sps:$4 sm:$0xff]   ;;  %v1385_v24 = vld [vmem:[#allocation8 + $0xc4] ss:$16 sps:$4 sm:$0xff]   ;;  %716 = vmatprep.subr.bf16.mxu0 %v1379_v22  ;;  %v1171_v50 = vld [vmem:[%s1746_s2] ss:$0 sm:$0xff] }
  0x47   :  { %269 = vmatprep.subr.bf16.mxu1 %v1359_v8  ;;  %717 = vmatpush1.bf16.msra.mxu0 %v1377_v21  ;;  %v1383_v25 = vld [vmem:[#allocation8 + $0xc0] ss:$16 sps:$4 sm:$0xff]   ;;  %v1391_v26 = vld [vmem:[#allocation8 + $0xa4] ss:$16 sps:$4 sm:$0xff]   ;;  %v1380_v56 = vld [vmem:[#allocation8 + $0xe8] ss:$16 sps:$4 sm:$0xff]  }
  0x48   :  { %718 = vmatprep.subr.bf16.mxu0 %v1385_v24  ;;  %v1389_v27 = vld [vmem:[#allocation8 + $0xa0] ss:$16 sps:$4 sm:$0xff]   ;;  %v1397_v28 = vld [vmem:[#allocation8 + $0x84] ss:$16 sps:$4 sm:$0xff]   ;;  %v1388_v58 = vld [vmem:[#allocation8 + $0xcc] ss:$16 sps:$4 sm:$0xff]  }
  0x49   :  { %v1395_v29 = vld [vmem:[#allocation8 + $0x80] ss:$16 sps:$4 sm:$0xff]   ;;  %v1403_v30 = vld [vmem:[#allocation8 + $0x64] ss:$16 sps:$4 sm:$0xff]   ;;  %v1386_v60 = vld [vmem:[#allocation8 + $0xc8] ss:$16 sps:$4 sm:$0xff]  }
  0x4a   :  { %270 = vmatpush1.bf16.msra.mxu1 %v1361_v9  ;;  %v1401_v31 = vld [vmem:[#allocation8 + $0x60] ss:$16 sps:$4 sm:$0xff]   ;;  %v1409_v32 = vld [vmem:[#allocation8 + $0x44] ss:$16 sps:$4 sm:$0xff]   ;;  %v1394_v61 = vld [vmem:[#allocation8 + $0xac] ss:$16 sps:$4 sm:$0xff]  }
  0x4b   :  { %271 = vmatprep.subr.bf16.mxu1 %v1362_v10  ;;  %719 = vmatpush1.bf16.msra.mxu0 %v1383_v25  ;;  %v1407_v33 = vld [vmem:[#allocation8 + $0x40] ss:$16 sps:$4 sm:$0xff]   ;;  %v1415_v34 = vld [vmem:[#allocation8 + $0x24] ss:$16 sps:$4 sm:$0xff]   ;;  %v1392_v62 = vld [vmem:[#allocation8 + $0xa8] ss:$16 sps:$4 sm:$0xff]  }
  0x4c   :  { %720 = vmatprep.subr.bf16.mxu0 %v1391_v26  ;;  %v1413_v35 = vld [vmem:[#allocation8 + $0x20] ss:$16 sps:$4 sm:$0xff]   ;;  %v1421_v36 = vld [vmem:[#allocation8 + $0x4] ss:$16 sps:$4 sm:$0xff]   ;;  %v1400_v63 = vld [vmem:[#allocation8 + $0x8c] ss:$16 sps:$4 sm:$0xff]  }
  0x4d   :  { %v1419_v37 = vld [vmem:[#allocation8] ss:$16 sps:$4 sm:$0xff]   ;;  %v1427_v38 = vld [vmem:[#allocation8 + $0x1e4] ss:$16 sps:$4 sm:$0xff]   ;;  %v1398_v0 = vld [vmem:[#allocation8 + $0x88] ss:$16 sps:$4 sm:$0xff]  }
  0x4e   :  { %272 = vmatpush1.bf16.msra.mxu1 %v1364_v11  ;;  %v1425_v39 = vld [vmem:[#allocation8 + $0x1e0] ss:$16 sps:$4 sm:$0xff]   ;;  %v1433_v40 = vld [vmem:[#allocation8 + $0x1c4] ss:$16 sps:$4 sm:$0xff]   ;;  %v1406_v1 = vld [vmem:[#allocation8 + $0x6c] ss:$16 sps:$4 sm:$0xff]  }
  0x4f   :  { %273 = vmatprep.subr.bf16.mxu1 %v1365_v12  ;;  %721 = vmatpush1.bf16.msra.mxu0 %v1389_v27  ;;  %v1431_v41 = vld [vmem:[#allocation8 + $0x1c0] ss:$16 sps:$4 sm:$0xff]   ;;  %v1439_v42 = vld [vmem:[#allocation8 + $0x1a4] ss:$16 sps:$4 sm:$0xff]   ;;  %v1404_v2 = vld [vmem:[#allocation8 + $0x68] ss:$16 sps:$4 sm:$0xff]  }
  0x50   :  { %722 = vmatprep.subr.bf16.mxu0 %v1397_v28  ;;  %v1437_v43 = vld [vmem:[#allocation8 + $0x1a0] ss:$16 sps:$4 sm:$0xff]   ;;  %v1445_v44 = vld [vmem:[#allocation8 + $0x184] ss:$16 sps:$4 sm:$0xff]   ;;  %v1412_v3 = vld [vmem:[#allocation8 + $0x4c] ss:$16 sps:$4 sm:$0xff]  }
  0x51   :  { %v1443_v45 = vld [vmem:[#allocation8 + $0x180] ss:$16 sps:$4 sm:$0xff]   ;;  %v1451_v46 = vld [vmem:[#allocation8 + $0x164] ss:$16 sps:$4 sm:$0xff]   ;;  %v1410_v4 = vld [vmem:[#allocation8 + $0x48] ss:$16 sps:$4 sm:$0xff]  }
  0x52   :  { %274 = vmatpush1.bf16.msra.mxu1 %v1367_v13  ;;  %v1449_v47 = vld [vmem:[#allocation8 + $0x160] ss:$16 sps:$4 sm:$0xff]   ;;  %v1457_v48 = vld [vmem:[#allocation8 + $0x144] ss:$16 sps:$4 sm:$0xff]   ;;  %v1418_v5 = vld [vmem:[#allocation8 + $0x2c] ss:$16 sps:$4 sm:$0xff]  }
  0x53   :  { %275 = vmatprep.subr.bf16.mxu1 %v1368_v14  ;;  %723 = vmatpush1.bf16.msra.mxu0 %v1395_v29  ;;  %v1455_v49 = vld [vmem:[#allocation8 + $0x140] ss:$16 sps:$4 sm:$0xff]   ;;  %v1416_v6 = vld [vmem:[#allocation8 + $0x28] ss:$16 sps:$4 sm:$0xff]   ;;  %v1424_v7 = vld [vmem:[#allocation8 + $0xc] ss:$16 sps:$4 sm:$0xff]  }
  0x54   :  { %724 = vmatprep.subr.bf16.mxu0 %v1403_v30  ;;  %v1422_v8 = vld [vmem:[#allocation8 + $0x8] ss:$16 sps:$4 sm:$0xff]   ;;  %v1430_v9 = vld [vmem:[#allocation8 + $0x1ec] ss:$16 sps:$4 sm:$0xff]   ;;  %v1463_v21 = vld [vmem:[#allocation8 + $0x124] ss:$16 sps:$4 sm:$0xff]  }
  0x55   :  { %v1428_v10 = vld [vmem:[#allocation8 + $0x1e8] ss:$16 sps:$4 sm:$0xff]   ;;  %v1436_v11 = vld [vmem:[#allocation8 + $0x1cc] ss:$16 sps:$4 sm:$0xff]   ;;  %v1469_v25 = vld [vmem:[#allocation8 + $0x104] ss:$16 sps:$4 sm:$0xff]  }
  0x56   :  { %276 = vmatpush1.bf16.msra.mxu1 %v1370_v15  ;;  %v1434_v12 = vld [vmem:[#allocation8 + $0x1c8] ss:$16 sps:$4 sm:$0xff]   ;;  %v1442_v13 = vld [vmem:[#allocation8 + $0x1ac] ss:$16 sps:$4 sm:$0xff]   ;;  %v1467_v27 = vld [vmem:[#allocation8 + $0x100] ss:$16 sps:$4 sm:$0xff]  }
  0x57   :  { %277 = vmatprep.subr.bf16.mxu1 %v1371_v16  ;;  %725 = vmatpush1.bf16.msra.mxu0 %v1401_v31  ;;  %v1440_v14 = vld [vmem:[#allocation8 + $0x1a8] ss:$16 sps:$4 sm:$0xff]   ;;  %v1448_v15 = vld [vmem:[#allocation8 + $0x18c] ss:$16 sps:$4 sm:$0xff]   ;;  %v175_v31 = vlaneseq  ;;  %s1649_s19 = smov [#allocation11]  }
  0x58   :  { %726 = vmatprep.subr.bf16.mxu0 %v1409_v32  ;;  %v1446_v16 = vld [vmem:[#allocation8 + $0x188] ss:$16 sps:$4 sm:$0xff]   ;;  %v1466_v22 = vld [vmem:[#allocation8 + $0x12c] ss:$16 sps:$4 sm:$0xff]   ;;  %s1160_s20 = sshll.u32 %s1649_s19, 4  ;;  %s1161_s20 = int_to_ptr.vmem [resolvable:$true] %s1160_s20 }
  0x59   :  { %v1458_v20 = vld [vmem:[#allocation8 + $0x148] ss:$16 sps:$4 sm:$0xff]   ;;  %v1472_v26 = vld [vmem:[#allocation8 + $0x10c] ss:$16 sps:$4 sm:$0xff]   ;;  %v1718_v32 = vshrl.u32 %v175_v31, 7  ;;  %p1612_p12 = scmp.lt.s32.totalorder %s1161_s20, %s1161_s20 }
  0x5a   :  { %278 = vmatpush1.bf16.msra.mxu1 %v1373_v17  ;;  %v1454_v17 = vld [vmem:[#allocation8 + $0x16c] ss:$16 sps:$4 sm:$0xff]   ;;  %v1464_v24 = vld [vmem:[#allocation8 + $0x128] ss:$16 sps:$4 sm:$0xff]  }
  0x5b   :  { %279 = vmatprep.subr.bf16.mxu1 %v1374_v18  ;;  %727 = vmatpush1.bf16.msra.mxu0 %v1407_v33  ;;  %v1452_v18 = vld [vmem:[#allocation8 + $0x168] ss:$16 sps:$4 sm:$0xff]   ;;  %v177_v33 = vsub.s32 0, %v1718_v32 }
  0x5c   :  { %728 = vmatprep.subr.bf16.mxu0 %v1415_v34  ;;  %v1470_v28 = vld [vmem:[#allocation8 + $0x108] ss:$16 sps:$4 sm:$0xff]  }
  0x5d   :  { %v1473_v29 = vld [vmem:[#allocation10 + $0x78] sm:$0xff]  }
  0x5e   :  { %280 = vmatpush1.bf16.msra.mxu1 %v1376_v19  ;;  %v1460_v19 = vld [vmem:[#allocation8 + $0x14c] ss:$16 sps:$4 sm:$0xff]   ;;  %v173_v34 = vld [vmem:[%s1748_s4] sm:$0x3] }
  0x5f   :  { %757 = vmatprep.subr.bf16.mxu1 %v1382_v23  ;;  %729 = vmatpush1.bf16.msra.mxu0 %v1413_v35  ;;  %v1461_v23 = vld [vmem:[#allocation8 + $0x120] ss:$16 sps:$4 sm:$0xff]   ;;  %v1474_v30 = vld [vmem:[#allocation10 + $0xf8] sm:$0xff]   ;;  %v181_v35 = vsub.s32 1, %v1718_v32 }
  0x60   :  { %730 = vmatprep.subr.bf16.mxu0 %v1421_v36  ;;  %v178_v36 = vrot.slane %v173_v34, %v177_v33 }
  0x63   :  { %731 = vmatpush1.bf16.msra.mxu0 %v1419_v37  ;;  %v182_v37 = vrot.slane %v173_v34, %v181_v35 }
  0x64   :  { %732 = vmatprep.subr.bf16.mxu0 %v1427_v38 }
  0x67   :  { %733 = vmatpush2.bf16.msra.mxu0 %v1425_v39 }
  0x68   :  { %734 = vmatprep.subr.bf16.mxu0 %v1433_v40 }
  0x6b   :  { %735 = vmatpush2.bf16.msra.mxu0 %v1431_v41 }
  0x6c   :  { %736 = vmatprep.subr.bf16.mxu0 %v1439_v42 }
  0x6f   :  { %737 = vmatpush2.bf16.msra.mxu0 %v1437_v43 }
  0x70   :  { %738 = vmatprep.subr.bf16.mxu0 %v1445_v44 }
  0x73   :  { %739 = vmatpush2.bf16.msra.mxu0 %v1443_v45 }
  0x74   :  { %740 = vmatprep.subr.bf16.mxu0 %v1451_v46 }
  0x77   :  { %741 = vmatpush2.bf16.msra.mxu0 %v1449_v47  ;;  %v1475_v47 = vld [vmem:[#allocation10 + $0x38] sm:$0xff]  }
  0x78   :  { %742 = vmatprep.subr.bf16.mxu0 %v1457_v48  ;;  %v1476_v48 = vld [vmem:[#allocation10 + $0xb8] sm:$0xff]  }
  0x7b   :  { %743 = vmatpush2.bf16.msra.mxu0 %v1455_v49 }
  0x7c   :  { %744 = vmatprep.subr.bf16.mxu0 %v1463_v21 }
  0x7f   :  { %745 = vmatpush2.bf16.msra.mxu0 %v1461_v23 }
  0x80   :  { %746 = vmatprep.subr.bf16.mxu0 %v1469_v25 }
  0x83   :  { %747 = vmatpush2.bf16.msra.mxu0 %v1467_v27 }
  0x84   :  { %1288 = vmatprep.subr.bf16.mxu0 %v1473_v29 }
 0x104   :  { %v149_v51 = vpop.f32.mrf.mxu0 }
 0x105   :  { %v150_v52 = vadd.f32 %v1171_v50, %v149_v51  ;;  %v1477_v50 = vld [vmem:[#allocation10 + $0x70] sm:$0xff]  }
 0x106   :  { %v1336_v53 = vpop.f32.mrf.mxu0  ;;  %v1478_v51 = vld [vmem:[#allocation10 + $0xf0] sm:$0xff]  }
 0x107   :  { %v155_v54 = vmax.f32 %v150_v52, 0.0  ;;  %v1479_v52 = vld [vmem:[#allocation10 + $0x30] sm:$0xff]  }
 0x108   :  { %v152_v55 = vpop.f32.mrf.mxu0  ;;  %v1480_v53 = vld [vmem:[#allocation10 + $0xb0] sm:$0xff]  }
 0x109   :  { %v156_v57 = vpack.c.bf16 %v155_v54, %v155_v54  ;;  %v1481_v54 = vld [vmem:[#allocation10 + $0x68] sm:$0xff]  }
 0x10a   :  { %v1337_v59 = vpop.f32.mrf.mxu0  ;;  %v1482_v55 = vld [vmem:[#allocation10 + $0xe8] sm:$0xff]  }
 0x10b   :  { %298 = vmatmul.mubr.bf16.vlgmr.msra.gmra.mxu1 %v156_v57  ;;  %v1484_v57 = vld [vmem:[#allocation10 + $0xa8] sm:$0xff]   ;;  %v1486_v59 = vld [vmem:[#allocation10 + $0xe0] sm:$0xff]  }
 0x10c   :  { %758 = vmatpush1.bf16.msra.mxu1 %v1380_v56  ;;  %v1483_v56 = vld [vmem:[#allocation10 + $0x28] sm:$0xff]  }
 0x10d   :  { %759 = vmatprep.subr.bf16.mxu1 %v1388_v58  ;;  %v1485_v58 = vld [vmem:[#allocation10 + $0x60] sm:$0xff]  }
 0x110   :  { %760 = vmatpush1.bf16.msra.mxu1 %v1386_v60  ;;  %v1487_v60 = vld [vmem:[#allocation10 + $0x20] sm:$0xff]  }
 0x111   :  { %761 = vmatprep.subr.bf16.mxu1 %v1394_v61  ;;  %v1488_v61 = vld [vmem:[#allocation10 + $0xa0] sm:$0xff]  }
 0x114   :  { %762 = vmatpush1.bf16.msra.mxu1 %v1392_v62  ;;  %v1489_v62 = vld [vmem:[#allocation10 + $0x58] sm:$0xff]  }
 0x115   :  { %763 = vmatprep.subr.bf16.mxu1 %v1400_v63  ;;  %v1490_v63 = vld [vmem:[#allocation10 + $0xd8] sm:$0xff]  }
 0x118   :  { %764 = vmatpush1.bf16.msra.mxu1 %v1398_v0  ;;  %v1491_v0 = vld [vmem:[#allocation10 + $0x18] sm:$0xff]  }
 0x119   :  { %765 = vmatprep.subr.bf16.mxu1 %v1406_v1  ;;  %v1492_v1 = vld [vmem:[#allocation10 + $0x98] sm:$0xff]  }
 0x11c   :  { %766 = vmatpush1.bf16.msra.mxu1 %v1404_v2  ;;  %v1493_v2 = vld [vmem:[#allocation10 + $0x50] sm:$0xff]  }
 0x11d   :  { %767 = vmatprep.subr.bf16.mxu1 %v1412_v3  ;;  %v1494_v3 = vld [vmem:[#allocation10 + $0xd0] sm:$0xff]  }
 0x120   :  { %768 = vmatpush1.bf16.msra.mxu1 %v1410_v4  ;;  %v1495_v4 = vld [vmem:[#allocation10 + $0x10] sm:$0xff]  }
 0x121   :  { %769 = vmatprep.subr.bf16.mxu1 %v1418_v5  ;;  %v1496_v5 = vld [vmem:[#allocation10 + $0x90] sm:$0xff]  }
 0x124   :  { %770 = vmatpush1.bf16.msra.mxu1 %v1416_v6  ;;  %v1497_v6 = vld [vmem:[#allocation10 + $0x48] sm:$0xff]  }
 0x125   :  { %771 = vmatprep.subr.bf16.mxu1 %v1424_v7  ;;  %v1498_v7 = vld [vmem:[#allocation10 + $0xc8] sm:$0xff]  }
 0x128   :  { %772 = vmatpush1.bf16.msra.mxu1 %v1422_v8  ;;  %v1499_v8 = vld [vmem:[#allocation10 + $0x8] sm:$0xff]  }
 0x129   :  { %773 = vmatprep.subr.bf16.mxu1 %v1430_v9  ;;  %v1500_v9 = vld [vmem:[#allocation10 + $0x88] sm:$0xff]  }
 0x12c   :  { %774 = vmatpush2.bf16.msra.mxu1 %v1428_v10  ;;  %v1501_v10 = vld [vmem:[#allocation10 + $0x40] sm:$0xff]  }
 0x12d   :  { %775 = vmatprep.subr.bf16.mxu1 %v1436_v11  ;;  %v1502_v11 = vld [vmem:[#allocation10 + $0xc0] sm:$0xff]  }
 0x130   :  { %776 = vmatpush2.bf16.msra.mxu1 %v1434_v12  ;;  %v1503_v12 = vld [vmem:[#allocation10] sm:$0xff]  }
 0x131   :  { %777 = vmatprep.subr.bf16.mxu1 %v1442_v13  ;;  %v1504_v13 = vld [vmem:[#allocation10 + $0x80] sm:$0xff]  }
 0x134   :  { %778 = vmatpush2.bf16.msra.mxu1 %v1440_v14  ;;  %v386_v14 = vsub.s32 2, %v1718_v32 }
 0x135   :  { %779 = vmatprep.subr.bf16.mxu1 %v1448_v15  ;;  %v374_v15 = vld [vmem:[%s1750_s6] sm:$0xf] }
 0x138   :  { %780 = vmatpush2.bf16.msra.mxu1 %v1446_v16  ;;  %v390_v16 = vsub.s32 3, %v1718_v32 }
 0x139   :  { %781 = vmatprep.subr.bf16.mxu1 %v1454_v17  ;;  %v379_v17 = vrot.slane %v374_v15, %v177_v33 }
 0x13c   :  { %782 = vmatpush2.bf16.msra.mxu1 %v1452_v18  ;;  %v387_v18 = vrot.slane %v374_v15, %v386_v14 }
 0x13d   :  { %783 = vmatprep.subr.bf16.mxu1 %v1460_v19  ;;  %v383_v19 = vrot.slane %v374_v15, %v181_v35 }
 0x140   :  { %784 = vmatpush2.bf16.msra.mxu1 %v1458_v20  ;;  %v391_v20 = vrot.slane %v374_v15, %v390_v16 }
 0x141   :  { %785 = vmatprep.subr.bf16.mxu1 %v1466_v22 }
 0x144   :  { %786 = vmatpush2.bf16.msra.mxu1 %v1464_v24 }
 0x145   :  { %787 = vmatprep.subr.bf16.mxu1 %v1472_v26 }
 0x148   :  { %788 = vmatpush2.bf16.msra.mxu1 %v1470_v28 }
 0x149   :  { %1310 = vmatprep.subr.bf16.mxu1 %v1474_v30 }
 0x1cb   :  { %v299_v38 = vpop.f32.mrf.mxu1 }
 0x1cc   :  { %v300_v39 = vadd.f32 %v299_v38, %v178_v36 }
 0x1cd   :  { %v301_v40 = vpop.f32.mrf.mxu1 }
 0x1ce   :  { %v302_v41 = vadd.f32 %v301_v40, %v182_v37  ;;  %v306_v42 = vmax.f32 %v300_v39, 0.0 }
 0x1cf   :  { %v303_v43 = vpop.f32.mrf.mxu1 }
 0x1d0   :  { %v307_v44 = vmax.f32 %v302_v41, 0.0  ;;  %v308_v49 = vpack.c.bf16 %v306_v42, %v306_v42  ;;  %v1253_v43 = vld [vmem:[%s1752_s8] ss:$0 sm:$0xff]  ;;  %s1607_s8 = scalar_lea.vmem %s1161_s20, 128 }
 0x1d1   :  { %v304_v45 = vpop.f32.mrf.mxu1  ;;  %p1608_p11 = scmp.ne.s32.totalorder %s1161_s20, %s1607_s8  ;;  %p1613_p13 = scmp.lt.s32.totalorder %s1607_s8, %s1607_s8 }
 0x1d2   :  { %v309_v46 = vpack.c.bf16 %v307_v44, %v307_v44 }
 0x1d3   :  { %p1614_p0 = por %p1613_p13, %p1612_p12 }
 0x1d4   :  { %748 = vmatprep.mubr.bf16.mxu0 %v309_v46  ;;  %789 = vmatprep.mubr.bf16.mxu1 %v309_v46 }
 0x1d5   :  { %749 = vmatmul.mubr.bf16.vlgmr.msra.gmra.mxu0 %v308_v49  ;;  %790 = vmatmul.mubr.bf16.vlgmr.msra.gmra.mxu1 %v308_v49  ;;  %p1615_p1 = pnand %p1614_p0, %p1608_p11 }
 0x1d6   :  { %1289 = vmatpush3.bf16.msra.mxu0 %v1475_v47  ;;  %1311 = vmatpush3.bf16.msra.mxu1 %v1476_v48 }
 0x1d7   :  { %1290 = vmatprep.subr.bf16.mxu0 %v1477_v50  ;;  %1312 = vmatprep.subr.bf16.mxu1 %v1478_v51 }
 0x1da   :  { %1291 = vmatpush3.bf16.msra.mxu0 %v1479_v52  ;;  %1313 = vmatpush3.bf16.msra.mxu1 %v1480_v53 }
 0x1db   :  { %1292 = vmatprep.subr.bf16.mxu0 %v1481_v54  ;;  %1314 = vmatprep.subr.bf16.mxu1 %v1482_v55 }
 0x1de   :  { %1293 = vmatpush3.bf16.msra.mxu0 %v1483_v56  ;;  %1315 = vmatpush3.bf16.msra.mxu1 %v1484_v57 }
 0x1df   :  { %1294 = vmatprep.subr.bf16.mxu0 %v1485_v58  ;;  %1316 = vmatprep.subr.bf16.mxu1 %v1486_v59 }
 0x1e2   :  { %1295 = vmatpush3.bf16.msra.mxu0 %v1487_v60  ;;  %1317 = vmatpush3.bf16.msra.mxu1 %v1488_v61 }
 0x1e3   :  { %1296 = vmatprep.subr.bf16.mxu0 %v1489_v62  ;;  %1318 = vmatprep.subr.bf16.mxu1 %v1490_v63 }
 0x1e6   :  { %1297 = vmatpush3.bf16.msra.mxu0 %v1491_v0  ;;  %1319 = vmatpush3.bf16.msra.mxu1 %v1492_v1 }
 0x1e7   :  { %1298 = vmatprep.subr.bf16.mxu0 %v1493_v2  ;;  %1320 = vmatprep.subr.bf16.mxu1 %v1494_v3 }
 0x1ea   :  { %1299 = vmatpush3.bf16.msra.mxu0 %v1495_v4  ;;  %1321 = vmatpush3.bf16.msra.mxu1 %v1496_v5 }
 0x1eb   :  { %1300 = vmatprep.subr.bf16.mxu0 %v1497_v6  ;;  %1322 = vmatprep.subr.bf16.mxu1 %v1498_v7 }
 0x1ee   :  { %1301 = vmatpush3.bf16.msra.mxu0 %v1499_v8  ;;  %1323 = vmatpush3.bf16.msra.mxu1 %v1500_v9 }
 0x1ef   :  { %1302 = vmatprep.subr.bf16.mxu0 %v1501_v10  ;;  %1324 = vmatprep.subr.bf16.mxu1 %v1502_v11 }
 0x1f2   :  { %1303 = vmatpush3.bf16.msra.mxu0 %v1503_v12  ;;  %1325 = vmatpush3.bf16.msra.mxu1 %v1504_v13 }
 0x295   :  { %v750_v21 = vpop.f32.mrf.mxu0  ;;  %v791_v22 = vpop.f32.mrf.mxu1 }
 0x296   :  { %v751_v23 = vadd.f32 %v750_v21, %v379_v17  ;;  %v792_v24 = vadd.f32 %v791_v22, %v387_v18 }
 0x297   :  { %v752_v25 = vpop.f32.mrf.mxu0  ;;  %v793_v26 = vpop.f32.mrf.mxu1 }
 0x298   :  { %v753_v27 = vadd.f32 %v752_v25, %v383_v19  ;;  %v794_v28 = vadd.f32 %v793_v26, %v391_v20  ;;  %v798_v29 = vmax.f32 %v751_v23, 0.0  ;;  %v800_v30 = vmax.f32 %v792_v24, 0.0 }
 0x299   :  { %v754_v31 = vpop.f32.mrf.mxu0  ;;  %v795_v34 = vpop.f32.mrf.mxu1 }
 0x29a   :  { %v799_v36 = vmax.f32 %v753_v27, 0.0  ;;  %v801_v37 = vmax.f32 %v794_v28, 0.0  ;;  %v802_v35 = vpack.c.bf16 %v798_v29, %v798_v29  ;;  %v804_v40 = vpack.c.bf16 %v800_v30, %v800_v30 }
 0x29b   :  { %v755_v33 = vpop.f32.mrf.mxu0  ;;  %v796_v38 = vpop.f32.mrf.mxu1 }
 0x29c   :  { %v803_v39 = vpack.c.bf16 %v799_v36, %v799_v36  ;;  %v805_v32 = vpack.c.bf16 %v801_v37, %v801_v37 }
 0x29e   :  { %1101 = vmatprep.mubr.bf16.mxu0 %v803_v39  ;;  %1141 = vmatprep.mubr.bf16.mxu1 %v805_v32 }
 0x29f   :  { %1102 = vmatmul.mubr.bf16.vlgmr.msra.gmra.mxu0 %v802_v35  ;;  %1142 = vmatmul.mubr.bf16.vlgmr.msra.gmra.mxu1 %v804_v40 }
 0x35f   :  { %v1304_v41 = vpop.f32.mrf.mxu0  ;;  %v1326_v42 = vpop.f32.mrf.mxu1 }
 0x361   :  { %v1305_v44 = vpop.f32.mrf.mxu0  ;;  %v1327_v45 = vpop.f32.mrf.mxu1 }
 0x362   :  { %v1306_v46 = vadd.f32 %v1305_v44, %v1304_v41  ;;  %v1328_v50 = vadd.f32 %v1327_v45, %v1326_v42 }
 0x363   :  { %v1307_v47 = vpop.f32.mrf.mxu0  ;;  %v1329_v48 = vpop.f32.mrf.mxu1 }
 0x364   :  { %v1104_v49 = vadd.f32 %v1306_v46, %v1253_v43 }
 0x365   :  { %v1308_v51 = vpop.f32.mrf.mxu0  ;;  %v1330_v52 = vpop.f32.mrf.mxu1 }
 0x366   :  { %v1144_v53 = vadd.f32 %v1328_v50, %v1104_v49 }
 0x368   :  { %v1149_v54 = vmul.f32 0.5, %v1144_v53 }
 0x36a   :  { %1505 = vtanh.f32 %v1149_v54 }
 0x377   :  { %v1506_v55 = vpop.eup %1505 }
 0x378   :  { %v1151_v56 = vadd.f32 1.0, %v1506_v55 }
 0x37a   :  { %v1152_v57 = vmul.f32 0.5, %v1151_v56 }
 0x37c   :  { %1153 = vst [vmem:[#allocation11] sm:$0xff] %v1152_v57 }
 0x37d   :  { %1618 = shalt.err (!%p1615_p1)
}
 0x37e   :  { %1163 = dma.vmem_to_hbm [thread:$0]  %s1161_s20, 128, %s1753_s9, [#allocation4]  }
 0x37f   :  { %1633 = dma.done.wait [#allocation4], 128  }
 0x380   :  { %1634 = vsyncadd [#allocation4], 4294967168 }
 0x381   :  { %1167 = vsyncpa [#allocation3], 1 }
 0x382   :  { %1168 = vsyncpa [#allocation6], 1 }
 0x383   :  { %1169 = vsyncpa [#allocation9], 1 }
 0x384   :  { %1170 = vsyncpa [#allocation4], 1 }

// kernel: tpu_custom_call.1
= control target key start
LH: loop header
LB: loop body
LE: loop exit
PB: predicated region body
PF: predicated region fallthrough
CT: control target
= control target key end

     0   :  { %14 = vsyncpa [#allocation3], 0  ;;  %s1744_s0 = inlined_call_operand.hbm [shape: bf16[8,8], index: 0, kind: input, shape index: {}]   ;;  %s1745_s1 = inlined_call_operand.hbm [shape: bf16[8,128], index: 1, kind: input, shape index: {}]   ;;  %s1746_s2 = inlined_call_operand.vmem [shape: f32[1,128], index: 2, kind: input, shape index: {}]   ;;  %s1747_s3 = inlined_call_operand.hbm [shape: bf16[128,256], index: 3, kind: input, shape index: {}]   ;;  %s1748_s4 = inlined_call_operand.vmem [shape: f32[1,256], index: 4, kind: input, shape index: {}]   ;;  %s1749_s5 = inlined_call_operand.hbm [shape: bf16[256,512], index: 5, kind: input, shape index: {}]   ;;  %s1750_s6 = inlined_call_operand.vmem [shape: f32[1,512], index: 6, kind: input, shape index: {}]   ;;  %s1751_s7 = inlined_call_operand.hbm [shape: bf16[512,128], index: 7, kind: input, shape index: {}]   ;;  %s1752_s8 = inlined_call_operand.vmem [shape: f32[1,128], index: 8, kind: input, shape index: {}]   ;;  %s1753_s9 = inlined_call_operand.hbm [shape: f32[8,128], index: 9, kind: output, shape index: {}]  }
   0x1   :  { %15 = vsyncpa [#allocation6], 0 }
   0x2   :  { %16 = vsyncpa [#allocation9], 0 }
   0x3   :  { %17 = vsyncpa [#allocation4], 0  ;;  %s1635_s30 = smov [#allocation5]   ;;  %s1636_s11 = smov [#allocation8]  }
   0x4   :  { %s34_s10 = sshll.u32 %s1635_s30, 4  ;;  %s59_s12 = sshll.u32 %s1636_s11, 4  ;;  %s35_s10 = int_to_ptr.vmem [resolvable:$true] %s34_s10  ;;  %s60_s12 = int_to_ptr.vmem [resolvable:$true] %s59_s12 }
   0x5   :  { %s1515_s13 = scalar_lea.vmem %s35_s10, 64  ;;  %p1520_p1 = scmp.lt.s32.totalorder %s35_s10, %s35_s10 }
   0x6   :  { %p1516_p0 = scmp.ne.s32.totalorder %s35_s10, %s1515_s13  ;;  %p1521_p2 = scmp.lt.s32.totalorder %s1515_s13, %s1515_s13 }
   0x8   :  { %p1522_p3 = por %p1521_p2, %p1520_p1 }
   0xa   :  { %p1523_p4 = pnand %p1522_p3, %p1516_p0 }
   0xc   :  { %1526 = shalt.err (!%p1523_p4)
}
   0xd   :  { %37 = dma.hbm_to_vmem [thread:$0]  %s1745_s1, 64, %s35_s10, [#allocation6]  }
   0xe   :  { %s1535_s16 = scalar_lea.vmem %s60_s12, 8192  ;;  %p1540_p6 = scmp.lt.s32.totalorder %s60_s12, %s60_s12 }
   0xf   :  { %p1536_p5 = scmp.ne.s32.totalorder %s60_s12, %s1535_s16  ;;  %p1541_p7 = scmp.lt.s32.totalorder %s1535_s16, %s1535_s16 }
  0x11   :  { %p1542_p8 = por %p1541_p7, %p1540_p6 }
  0x13   :  { %p1543_p9 = pnand %p1542_p8, %p1536_p5 }
  0x15   :  { %1546 = shalt.err (!%p1543_p9)
}
  0x16   :  { %s1637_s17 = smov 256   ;;  %s1638_s18 = smov 16  }
  0x17   :  { %65 = dma.hbm_to_vmem [thread:$0]  %s1749_s5, 8192, %s60_s12, [#allocation9], %s1637_s17, %s1637_s17, %s1638_s18  }
  0x18   :  { %s1639_s21 = smov [#allocation2]   ;;  %s1640_s23 = smov [#allocation7]  }
  0x19   :  { %s24_s22 = sshll.u32 %s1639_s21, 4  ;;  %s45_s24 = sshll.u32 %s1640_s23, 4  ;;  %s25_s22 = int_to_ptr.vmem [resolvable:$true] %s24_s22  ;;  %s46_s24 = int_to_ptr.vmem [resolvable:$true] %s45_s24 }
  0x1a   :  { %s1555_s1 = scalar_lea.vmem %s25_s22, 64  ;;  %p1560_p11 = scmp.lt.s32.totalorder %s25_s22, %s25_s22 }
  0x1b   :  { %p1556_p10 = scmp.ne.s32.totalorder %s25_s22, %s1555_s1  ;;  %p1561_p12 = scmp.lt.s32.totalorder %s1555_s1, %s1555_s1 }
  0x1d   :  { %p1562_p13 = por %p1561_p12, %p1560_p11 }
  0x1f   :  { %p1563_p0 = pnand %p1562_p13, %p1556_p10 }
  0x21   :  { %1566 = shalt.err (!%p1563_p0)
}
  0x22   :  { %27 = dma.hbm_to_vmem [thread:$0]  %s1744_s0, 64, %s25_s22, [#allocation3]  }
  0x23   :  { %s1575_s27 = scalar_lea.vmem %s46_s24, 2048  ;;  %p1580_p2 = scmp.lt.s32.totalorder %s46_s24, %s46_s24 }
  0x24   :  { %p1576_p1 = scmp.ne.s32.totalorder %s46_s24, %s1575_s27  ;;  %p1581_p3 = scmp.lt.s32.totalorder %s1575_s27, %s1575_s27 }
  0x26   :  { %p1582_p4 = por %p1581_p3, %p1580_p2 }
  0x28   :  { %p1583_p5 = pnand %p1582_p4, %p1576_p1 }
  0x2a   :  { %1586 = shalt.err (!%p1583_p5)
}
  0x2b   :  { %s1641_s5 = smov 128   ;;  %s1642_s28 = smov 8  }
  0x2c   :  { %51 = dma.hbm_to_vmem [thread:$0]  %s1747_s3, 2048, %s46_s24, [#allocation6], %s1641_s5, %s1641_s5, %s1642_s28  }
  0x2d   :  { %s1643_s10 = smov [#allocation10]  }
  0x2e   :  { %s73_s11 = sshll.u32 %s1643_s10, 4  ;;  %s74_s11 = int_to_ptr.vmem [resolvable:$true] %s73_s11 }
  0x2f   :  { %s1595_s12 = scalar_lea.vmem %s74_s11, 4096  ;;  %p1600_p7 = scmp.lt.s32.totalorder %s74_s11, %s74_s11 }
  0x30   :  { %p1596_p6 = scmp.ne.s32.totalorder %s74_s11, %s1595_s12  ;;  %p1601_p8 = scmp.lt.s32.totalorder %s1595_s12, %s1595_s12 }
  0x32   :  { %p1602_p9 = por %p1601_p8, %p1600_p7 }
  0x34   :  { %p1603_p10 = pnand %p1602_p9, %p1596_p6 }
  0x36   :  { %1606 = shalt.err (!%p1603_p10)
}
  0x37   :  { %s1644_s0 = smov 64   ;;  %s1645_s13 = smov 4  }
  0x38   :  { %79 = dma.hbm_to_vmem [thread:$0]  %s1751_s7, 4096, %s74_s11, [#allocation9], %s1644_s0, %s1644_s0, %s1645_s13  }
  0x39   :  { %1627 = dma.done.wait [#allocation3], 64  }
  0x3a   :  { %1628 = vsyncadd [#allocation3], 4294967232 }
  0x3b   :  { %1629 = dma.done.wait [#allocation6], 2112  }
  0x3c   :  { %1630 = vsyncadd [#allocation6], 4294965184 }
  0x3d   :  { %1631 = dma.done.wait [#allocation9], 12288  }
  0x3e   :  { %1632 = vsyncadd [#allocation9], 4294955008  ;;  %v1646_v0 = vmov 0.0   ;;  %vm1647_vm0 = vmmov 0   ;;  %vm111_vm1 = vcmask 1043456   ;;  %vm107_vm2 = vcmask 64512  }
  0x3f   :  { %1332 = vmatprep.subr.bf16.mxu0 %v1646_v0  ;;  %1334 = vmatprep.mubr.msk.bf16.mxu0 %vm1647_vm0, %v1646_v0  ;;  %v99_v1 = vld [vmem:[#allocation5] sm:$0xf]  ;;  %v98_v2 = vld [vmem:[#allocation2] sm:$0xf]  ;;  %v1356_v6 = vld [vmem:[#allocation7 + $0x64] ss:$8 sps:$4 sm:$0xff]  }
  0x40   :  { %v113_v3 = vsel %vm111_vm1, %v99_v1, 0  ;;  %v1353_v4 = vld [vmem:[#allocation7 + $0x74] ss:$8 sps:$4 sm:$0xff]   ;;  %v1355_v5 = vld [vmem:[#allocation7 + $0x70] ss:$8 sps:$4 sm:$0xff]   ;;  %v1648_v20 = vmov 0  }
  0x41   :  { %1333 = vmatpush3.bf16.msra.mxu0 %v113_v3  ;;  %265 = vmatprep.subr.bf16.mxu1 %v1353_v4  ;;  %v1358_v7 = vld [vmem:[#allocation7 + $0x60] ss:$8 sps:$4 sm:$0xff]   ;;  %v1359_v8 = vld [vmem:[#allocation7 + $0x54] ss:$8 sps:$4 sm:$0xff]   ;;  %v1361_v9 = vld [vmem:[#allocation7 + $0x50] ss:$8 sps:$4 sm:$0xff]  }
  0x42   :  { %266 = vmatpush1.bf16.msra.mxu1 %v1355_v5  ;;  %v1362_v10 = vld [vmem:[#allocation7 + $0x44] ss:$8 sps:$4 sm:$0xff]   ;;  %v1364_v11 = vld [vmem:[#allocation7 + $0x40] ss:$8 sps:$4 sm:$0xff]   ;;  %v1365_v12 = vld [vmem:[#allocation7 + $0x34] ss:$8 sps:$4 sm:$0xff]   ;;  %297 = vmatprep.mubr.bf16.mxu1 %v1648_v20 }
  0x43   :  { %267 = vmatprep.subr.bf16.mxu1 %v1356_v6  ;;  %v1367_v13 = vld [vmem:[#allocation7 + $0x30] ss:$8 sps:$4 sm:$0xff]   ;;  %v1368_v14 = vld [vmem:[#allocation7 + $0x24] ss:$8 sps:$4 sm:$0xff]   ;;  %v1370_v15 = vld [vmem:[#allocation7 + $0x20] ss:$8 sps:$4 sm:$0xff]  }
  0x44   :  { %1335 = vmatmul.mubr.msk.bf16.vlgmr.msra.gmra.mxu0 %vm107_vm2, %v98_v2  ;;  %v1371_v16 = vld [vmem:[#allocation7 + $0x14] ss:$8 sps:$4 sm:$0xff]   ;;  %v1373_v17 = vld [vmem:[#allocation7 + $0x10] ss:$8 sps:$4 sm:$0xff]   ;;  %v1374_v18 = vld [vmem:[#allocation7 + $0x4] ss:$8 sps:$4 sm:$0xff]  }
  0x45   :  { %v1376_v19 = vld [vmem:[#allocation7] ss:$8 sps:$4 sm:$0xff]   ;;  %v1379_v22 = vld [vmem:[#allocation8 + $0xe4] ss:$16 sps:$4 sm:$0xff]   ;;  %v1382_v23 = vld [vmem:[#allocation8 + $0xec] ss:$16 sps:$4 sm:$0xff]  }
  0x46   :  { %268 = vmatpush1.bf16.msra.mxu1 %v1358_v7  ;;  %v1377_v21 = vld [vmem:[#allocation8 + $0xe0] ss:$16 sps:$4 sm:$0xff]   ;;  %v1385_v24 = vld [vmem:[#allocation8 + $0xc4] ss:$16 sps:$4 sm:$0xff]   ;;  %716 = vmatprep.subr.bf16.mxu0 %v1379_v22  ;;  %v1171_v50 = vld [vmem:[%s1746_s2] ss:$0 sm:$0xff] }
  0x47   :  { %269 = vmatprep.subr.bf16.mxu1 %v1359_v8  ;;  %717 = vmatpush1.bf16.msra.mxu0 %v1377_v21  ;;  %v1383_v25 = vld [vmem:[#allocation8 + $0xc0] ss:$16 sps:$4 sm:$0xff]   ;;  %v1391_v26 = vld [vmem:[#allocation8 + $0xa4] ss:$16 sps:$4 sm:$0xff]   ;;  %v1380_v56 = vld [vmem:[#allocation8 + $0xe8] ss:$16 sps:$4 sm:$0xff]  }
  0x48   :  { %718 = vmatprep.subr.bf16.mxu0 %v1385_v24  ;;  %v1389_v27 = vld [vmem:[#allocation8 + $0xa0] ss:$16 sps:$4 sm:$0xff]   ;;  %v1397_v28 = vld [vmem:[#allocation8 + $0x84] ss:$16 sps:$4 sm:$0xff]   ;;  %v1388_v58 = vld [vmem:[#allocation8 + $0xcc] ss:$16 sps:$4 sm:$0xff]  }
  0x49   :  { %v1395_v29 = vld [vmem:[#allocation8 + $0x80] ss:$16 sps:$4 sm:$0xff]   ;;  %v1403_v30 = vld [vmem:[#allocation8 + $0x64] ss:$16 sps:$4 sm:$0xff]   ;;  %v1386_v60 = vld [vmem:[#allocation8 + $0xc8] ss:$16 sps:$4 sm:$0xff]  }
  0x4a   :  { %270 = vmatpush1.bf16.msra.mxu1 %v1361_v9  ;;  %v1401_v31 = vld [vmem:[#allocation8 + $0x60] ss:$16 sps:$4 sm:$0xff]   ;;  %v1409_v32 = vld [vmem:[#allocation8 + $0x44] ss:$16 sps:$4 sm:$0xff]   ;;  %v1394_v61 = vld [vmem:[#allocation8 + $0xac] ss:$16 sps:$4 sm:$0xff]  }
  0x4b   :  { %271 = vmatprep.subr.bf16.mxu1 %v1362_v10  ;;  %719 = vmatpush1.bf16.msra.mxu0 %v1383_v25  ;;  %v1407_v33 = vld [vmem:[#allocation8 + $0x40] ss:$16 sps:$4 sm:$0xff]   ;;  %v1415_v34 = vld [vmem:[#allocation8 + $0x24] ss:$16 sps:$4 sm:$0xff]   ;;  %v1392_v62 = vld [vmem:[#allocation8 + $0xa8] ss:$16 sps:$4 sm:$0xff]  }
  0x4c   :  { %720 = vmatprep.subr.bf16.mxu0 %v1391_v26  ;;  %v1413_v35 = vld [vmem:[#allocation8 + $0x20] ss:$16 sps:$4 sm:$0xff]   ;;  %v1421_v36 = vld [vmem:[#allocation8 + $0x4] ss:$16 sps:$4 sm:$0xff]   ;;  %v1400_v63 = vld [vmem:[#allocation8 + $0x8c] ss:$16 sps:$4 sm:$0xff]  }
  0x4d   :  { %v1419_v37 = vld [vmem:[#allocation8] ss:$16 sps:$4 sm:$0xff]   ;;  %v1427_v38 = vld [vmem:[#allocation8 + $0x1e4] ss:$16 sps:$4 sm:$0xff]   ;;  %v1398_v0 = vld [vmem:[#allocation8 + $0x88] ss:$16 sps:$4 sm:$0xff]  }
  0x4e   :  { %272 = vmatpush1.bf16.msra.mxu1 %v1364_v11  ;;  %v1425_v39 = vld [vmem:[#allocation8 + $0x1e0] ss:$16 sps:$4 sm:$0xff]   ;;  %v1433_v40 = vld [vmem:[#allocation8 + $0x1c4] ss:$16 sps:$4 sm:$0xff]   ;;  %v1406_v1 = vld [vmem:[#allocation8 + $0x6c] ss:$16 sps:$4 sm:$0xff]  }
  0x4f   :  { %273 = vmatprep.subr.bf16.mxu1 %v1365_v12  ;;  %721 = vmatpush1.bf16.msra.mxu0 %v1389_v27  ;;  %v1431_v41 = vld [vmem:[#allocation8 + $0x1c0] ss:$16 sps:$4 sm:$0xff]   ;;  %v1439_v42 = vld [vmem:[#allocation8 + $0x1a4] ss:$16 sps:$4 sm:$0xff]   ;;  %v1404_v2 = vld [vmem:[#allocation8 + $0x68] ss:$16 sps:$4 sm:$0xff]  }
  0x50   :  { %722 = vmatprep.subr.bf16.mxu0 %v1397_v28  ;;  %v1437_v43 = vld [vmem:[#allocation8 + $0x1a0] ss:$16 sps:$4 sm:$0xff]   ;;  %v1445_v44 = vld [vmem:[#allocation8 + $0x184] ss:$16 sps:$4 sm:$0xff]   ;;  %v1412_v3 = vld [vmem:[#allocation8 + $0x4c] ss:$16 sps:$4 sm:$0xff]  }
  0x51   :  { %v1443_v45 = vld [vmem:[#allocation8 + $0x180] ss:$16 sps:$4 sm:$0xff]   ;;  %v1451_v46 = vld [vmem:[#allocation8 + $0x164] ss:$16 sps:$4 sm:$0xff]   ;;  %v1410_v4 = vld [vmem:[#allocation8 + $0x48] ss:$16 sps:$4 sm:$0xff]  }
  0x52   :  { %274 = vmatpush1.bf16.msra.mxu1 %v1367_v13  ;;  %v1449_v47 = vld [vmem:[#allocation8 + $0x160] ss:$16 sps:$4 sm:$0xff]   ;;  %v1457_v48 = vld [vmem:[#allocation8 + $0x144] ss:$16 sps:$4 sm:$0xff]   ;;  %v1418_v5 = vld [vmem:[#allocation8 + $0x2c] ss:$16 sps:$4 sm:$0xff]  }
  0x53   :  { %275 = vmatprep.subr.bf16.mxu1 %v1368_v14  ;;  %723 = vmatpush1.bf16.msra.mxu0 %v1395_v29  ;;  %v1455_v49 = vld [vmem:[#allocation8 + $0x140] ss:$16 sps:$4 sm:$0xff]   ;;  %v1416_v6 = vld [vmem:[#allocation8 + $0x28] ss:$16 sps:$4 sm:$0xff]   ;;  %v1424_v7 = vld [vmem:[#allocation8 + $0xc] ss:$16 sps:$4 sm:$0xff]  }
  0x54   :  { %724 = vmatprep.subr.bf16.mxu0 %v1403_v30  ;;  %v1422_v8 = vld [vmem:[#allocation8 + $0x8] ss:$16 sps:$4 sm:$0xff]   ;;  %v1430_v9 = vld [vmem:[#allocation8 + $0x1ec] ss:$16 sps:$4 sm:$0xff]   ;;  %v1463_v21 = vld [vmem:[#allocation8 + $0x124] ss:$16 sps:$4 sm:$0xff]  }
  0x55   :  { %v1428_v10 = vld [vmem:[#allocation8 + $0x1e8] ss:$16 sps:$4 sm:$0xff]   ;;  %v1436_v11 = vld [vmem:[#allocation8 + $0x1cc] ss:$16 sps:$4 sm:$0xff]   ;;  %v1469_v25 = vld [vmem:[#allocation8 + $0x104] ss:$16 sps:$4 sm:$0xff]  }
  0x56   :  { %276 = vmatpush1.bf16.msra.mxu1 %v1370_v15  ;;  %v1434_v12 = vld [vmem:[#allocation8 + $0x1c8] ss:$16 sps:$4 sm:$0xff]   ;;  %v1442_v13 = vld [vmem:[#allocation8 + $0x1ac] ss:$16 sps:$4 sm:$0xff]   ;;  %v1467_v27 = vld [vmem:[#allocation8 + $0x100] ss:$16 sps:$4 sm:$0xff]  }
  0x57   :  { %277 = vmatprep.subr.bf16.mxu1 %v1371_v16  ;;  %725 = vmatpush1.bf16.msra.mxu0 %v1401_v31  ;;  %v1440_v14 = vld [vmem:[#allocation8 + $0x1a8] ss:$16 sps:$4 sm:$0xff]   ;;  %v1448_v15 = vld [vmem:[#allocation8 + $0x18c] ss:$16 sps:$4 sm:$0xff]   ;;  %v175_v31 = vlaneseq  ;;  %s1649_s19 = smov [#allocation11]  }
  0x58   :  { %726 = vmatprep.subr.bf16.mxu0 %v1409_v32  ;;  %v1446_v16 = vld [vmem:[#allocation8 + $0x188] ss:$16 sps:$4 sm:$0xff]   ;;  %v1466_v22 = vld [vmem:[#allocation8 + $0x12c] ss:$16 sps:$4 sm:$0xff]   ;;  %s1160_s20 = sshll.u32 %s1649_s19, 4  ;;  %s1161_s20 = int_to_ptr.vmem [resolvable:$true] %s1160_s20 }
  0x59   :  { %v1458_v20 = vld [vmem:[#allocation8 + $0x148] ss:$16 sps:$4 sm:$0xff]   ;;  %v1472_v26 = vld [vmem:[#allocation8 + $0x10c] ss:$16 sps:$4 sm:$0xff]   ;;  %v1718_v32 = vshrl.u32 %v175_v31, 7  ;;  %p1612_p12 = scmp.lt.s32.totalorder %s1161_s20, %s1161_s20 }
  0x5a   :  { %278 = vmatpush1.bf16.msra.mxu1 %v1373_v17  ;;  %v1454_v17 = vld [vmem:[#allocation8 + $0x16c] ss:$16 sps:$4 sm:$0xff]   ;;  %v1464_v24 = vld [vmem:[#allocation8 + $0x128] ss:$16 sps:$4 sm:$0xff]  }
  0x5b   :  { %279 = vmatprep.subr.bf16.mxu1 %v1374_v18  ;;  %727 = vmatpush1.bf16.msra.mxu0 %v1407_v33  ;;  %v1452_v18 = vld [vmem:[#allocation8 + $0x168] ss:$16 sps:$4 sm:$0xff]   ;;  %v177_v33 = vsub.s32 0, %v1718_v32 }
  0x5c   :  { %728 = vmatprep.subr.bf16.mxu0 %v1415_v34  ;;  %v1470_v28 = vld [vmem:[#allocation8 + $0x108] ss:$16 sps:$4 sm:$0xff]  }
  0x5d   :  { %v1473_v29 = vld [vmem:[#allocation10 + $0x78] sm:$0xff]  }
  0x5e   :  { %280 = vmatpush1.bf16.msra.mxu1 %v1376_v19  ;;  %v1460_v19 = vld [vmem:[#allocation8 + $0x14c] ss:$16 sps:$4 sm:$0xff]   ;;  %v173_v34 = vld [vmem:[%s1748_s4] sm:$0x3] }
  0x5f   :  { %757 = vmatprep.subr.bf16.mxu1 %v1382_v23  ;;  %729 = vmatpush1.bf16.msra.mxu0 %v1413_v35  ;;  %v1461_v23 = vld [vmem:[#allocation8 + $0x120] ss:$16 sps:$4 sm:$0xff]   ;;  %v1474_v30 = vld [vmem:[#allocation10 + $0xf8] sm:$0xff]   ;;  %v181_v35 = vsub.s32 1, %v1718_v32 }
  0x60   :  { %730 = vmatprep.subr.bf16.mxu0 %v1421_v36  ;;  %v178_v36 = vrot.slane %v173_v34, %v177_v33 }
  0x63   :  { %731 = vmatpush1.bf16.msra.mxu0 %v1419_v37  ;;  %v182_v37 = vrot.slane %v173_v34, %v181_v35 }
  0x64   :  { %732 = vmatprep.subr.bf16.mxu0 %v1427_v38 }
  0x67   :  { %733 = vmatpush2.bf16.msra.mxu0 %v1425_v39 }
  0x68   :  { %734 = vmatprep.subr.bf16.mxu0 %v1433_v40 }
  0x6b   :  { %735 = vmatpush2.bf16.msra.mxu0 %v1431_v41 }
  0x6c   :  { %736 = vmatprep.subr.bf16.mxu0 %v1439_v42 }
  0x6f   :  { %737 = vmatpush2.bf16.msra.mxu0 %v1437_v43 }
  0x70   :  { %738 = vmatprep.subr.bf16.mxu0 %v1445_v44 }
  0x73   :  { %739 = vmatpush2.bf16.msra.mxu0 %v1443_v45 }
  0x74   :  { %740 = vmatprep.subr.bf16.mxu0 %v1451_v46 }
  0x77   :  { %741 = vmatpush2.bf16.msra.mxu0 %v1449_v47  ;;  %v1475_v47 = vld [vmem:[#allocation10 + $0x38] sm:$0xff]  }
  0x78   :  { %742 = vmatprep.subr.bf16.mxu0 %v1457_v48  ;;  %v1476_v48 = vld [vmem:[#allocation10 + $0xb8] sm:$0xff]  }
  0x7b   :  { %743 = vmatpush2.bf16.msra.mxu0 %v1455_v49 }
  0x7c   :  { %744 = vmatprep.subr.bf16.mxu0 %v1463_v21 }
  0x7f   :  { %745 = vmatpush2.bf16.msra.mxu0 %v1461_v23 }
  0x80   :  { %746 = vmatprep.subr.bf16.mxu0 %v1469_v25 }
  0x83   :  { %747 = vmatpush2.bf16.msra.mxu0 %v1467_v27 }
  0x84   :  { %1288 = vmatprep.subr.bf16.mxu0 %v1473_v29 }
 0x104   :  { %v149_v51 = vpop.f32.mrf.mxu0 }
 0x105   :  { %v150_v52 = vadd.f32 %v1171_v50, %v149_v51  ;;  %v1477_v50 = vld [vmem:[#allocation10 + $0x70] sm:$0xff]  }
 0x106   :  { %v1336_v53 = vpop.f32.mrf.mxu0  ;;  %v1478_v51 = vld [vmem:[#allocation10 + $0xf0] sm:$0xff]  }
 0x107   :  { %v155_v54 = vmax.f32 %v150_v52, 0.0  ;;  %v1479_v52 = vld [vmem:[#allocation10 + $0x30] sm:$0xff]  }
 0x108   :  { %v152_v55 = vpop.f32.mrf.mxu0  ;;  %v1480_v53 = vld [vmem:[#allocation10 + $0xb0] sm:$0xff]  }
 0x109   :  { %v156_v57 = vpack.c.bf16 %v155_v54, %v155_v54  ;;  %v1481_v54 = vld [vmem:[#allocation10 + $0x68] sm:$0xff]  }
 0x10a   :  { %v1337_v59 = vpop.f32.mrf.mxu0  ;;  %v1482_v55 = vld [vmem:[#allocation10 + $0xe8] sm:$0xff]  }
 0x10b   :  { %298 = vmatmul.mubr.bf16.vlgmr.msra.gmra.mxu1 %v156_v57  ;;  %v1484_v57 = vld [vmem:[#allocation10 + $0xa8] sm:$0xff]   ;;  %v1486_v59 = vld [vmem:[#allocation10 + $0xe0] sm:$0xff]  }
 0x10c   :  { %758 = vmatpush1.bf16.msra.mxu1 %v1380_v56  ;;  %v1483_v56 = vld [vmem:[#allocation10 + $0x28] sm:$0xff]  }
 0x10d   :  { %759 = vmatprep.subr.bf16.mxu1 %v1388_v58  ;;  %v1485_v58 = vld [vmem:[#allocation10 + $0x60] sm:$0xff]  }
 0x110   :  { %760 = vmatpush1.bf16.msra.mxu1 %v1386_v60  ;;  %v1487_v60 = vld [vmem:[#allocation10 + $0x20] sm:$0xff]  }
 0x111   :  { %761 = vmatprep.subr.bf16.mxu1 %v1394_v61  ;;  %v1488_v61 = vld [vmem:[#allocation10 + $0xa0] sm:$0xff]  }
 0x114   :  { %762 = vmatpush1.bf16.msra.mxu1 %v1392_v62  ;;  %v1489_v62 = vld [vmem:[#allocation10 + $0x58] sm:$0xff]  }
 0x115   :  { %763 = vmatprep.subr.bf16.mxu1 %v1400_v63  ;;  %v1490_v63 = vld [vmem:[#allocation10 + $0xd8] sm:$0xff]  }
 0x118   :  { %764 = vmatpush1.bf16.msra.mxu1 %v1398_v0  ;;  %v1491_v0 = vld [vmem:[#allocation10 + $0x18] sm:$0xff]  }
 0x119   :  { %765 = vmatprep.subr.bf16.mxu1 %v1406_v1  ;;  %v1492_v1 = vld [vmem:[#allocation10 + $0x98] sm:$0xff]  }
 0x11c   :  { %766 = vmatpush1.bf16.msra.mxu1 %v1404_v2  ;;  %v1493_v2 = vld [vmem:[#allocation10 + $0x50] sm:$0xff]  }
 0x11d   :  { %767 = vmatprep.subr.bf16.mxu1 %v1412_v3  ;;  %v1494_v3 = vld [vmem:[#allocation10 + $0xd0] sm:$0xff]  }
 0x120   :  { %768 = vmatpush1.bf16.msra.mxu1 %v1410_v4  ;;  %v1495_v4 = vld [vmem:[#allocation10 + $0x10] sm:$0xff]  }
 0x121   :  { %769 = vmatprep.subr.bf16.mxu1 %v1418_v5  ;;  %v1496_v5 = vld [vmem:[#allocation10 + $0x90] sm:$0xff]  }
 0x124   :  { %770 = vmatpush1.bf16.msra.mxu1 %v1416_v6  ;;  %v1497_v6 = vld [vmem:[#allocation10 + $0x48] sm:$0xff]  }
 0x125   :  { %771 = vmatprep.subr.bf16.mxu1 %v1424_v7  ;;  %v1498_v7 = vld [vmem:[#allocation10 + $0xc8] sm:$0xff]  }
 0x128   :  { %772 = vmatpush1.bf16.msra.mxu1 %v1422_v8  ;;  %v1499_v8 = vld [vmem:[#allocation10 + $0x8] sm:$0xff]  }
 0x129   :  { %773 = vmatprep.subr.bf16.mxu1 %v1430_v9  ;;  %v1500_v9 = vld [vmem:[#allocation10 + $0x88] sm:$0xff]  }
 0x12c   :  { %774 = vmatpush2.bf16.msra.mxu1 %v1428_v10  ;;  %v1501_v10 = vld [vmem:[#allocation10 + $0x40] sm:$0xff]  }
 0x12d   :  { %775 = vmatprep.subr.bf16.mxu1 %v1436_v11  ;;  %v1502_v11 = vld [vmem:[#allocation10 + $0xc0] sm:$0xff]  }
 0x130   :  { %776 = vmatpush2.bf16.msra.mxu1 %v1434_v12  ;;  %v1503_v12 = vld [vmem:[#allocation10] sm:$0xff]  }
 0x131   :  { %777 = vmatprep.subr.bf16.mxu1 %v1442_v13  ;;  %v1504_v13 = vld [vmem:[#allocation10 + $0x80] sm:$0xff]  }
 0x134   :  { %778 = vmatpush2.bf16.msra.mxu1 %v1440_v14  ;;  %v386_v14 = vsub.s32 2, %v1718_v32 }
 0x135   :  { %779 = vmatprep.subr.bf16.mxu1 %v1448_v15  ;;  %v374_v15 = vld [vmem:[%s1750_s6] sm:$0xf] }
 0x138   :  { %780 = vmatpush2.bf16.msra.mxu1 %v1446_v16  ;;  %v390_v16 = vsub.s32 3, %v1718_v32 }
 0x139   :  { %781 = vmatprep.subr.bf16.mxu1 %v1454_v17  ;;  %v379_v17 = vrot.slane %v374_v15, %v177_v33 }
 0x13c   :  { %782 = vmatpush2.bf16.msra.mxu1 %v1452_v18  ;;  %v387_v18 = vrot.slane %v374_v15, %v386_v14 }
 0x13d   :  { %783 = vmatprep.subr.bf16.mxu1 %v1460_v19  ;;  %v383_v19 = vrot.slane %v374_v15, %v181_v35 }
 0x140   :  { %784 = vmatpush2.bf16.msra.mxu1 %v1458_v20  ;;  %v391_v20 = vrot.slane %v374_v15, %v390_v16 }
 0x141   :  { %785 = vmatprep.subr.bf16.mxu1 %v1466_v22 }
 0x144   :  { %786 = vmatpush2.bf16.msra.mxu1 %v1464_v24 }
 0x145   :  { %787 = vmatprep.subr.bf16.mxu1 %v1472_v26 }
 0x148   :  { %788 = vmatpush2.bf16.msra.mxu1 %v1470_v28 }
 0x149   :  { %1310 = vmatprep.subr.bf16.mxu1 %v1474_v30 }
 0x1cb   :  { %v299_v38 = vpop.f32.mrf.mxu1 }
 0x1cc   :  { %v300_v39 = vadd.f32 %v299_v38, %v178_v36 }
 0x1cd   :  { %v301_v40 = vpop.f32.mrf.mxu1 }
 0x1ce   :  { %v302_v41 = vadd.f32 %v301_v40, %v182_v37  ;;  %v306_v42 = vmax.f32 %v300_v39, 0.0 }
 0x1cf   :  { %v303_v43 = vpop.f32.mrf.mxu1 }
 0x1d0   :  { %v307_v44 = vmax.f32 %v302_v41, 0.0  ;;  %v308_v49 = vpack.c.bf16 %v306_v42, %v306_v42  ;;  %v1253_v43 = vld [vmem:[%s1752_s8] ss:$0 sm:$0xff]  ;;  %s1607_s8 = scalar_lea.vmem %s1161_s20, 128 }
 0x1d1   :  { %v304_v45 = vpop.f32.mrf.mxu1  ;;  %p1608_p11 = scmp.ne.s32.totalorder %s1161_s20, %s1607_s8  ;;  %p1613_p13 = scmp.lt.s32.totalorder %s1607_s8, %s1607_s8 }
 0x1d2   :  { %v309_v46 = vpack.c.bf16 %v307_v44, %v307_v44 }
 0x1d3   :  { %p1614_p0 = por %p1613_p13, %p1612_p12 }
 0x1d4   :  { %748 = vmatprep.mubr.bf16.mxu0 %v309_v46  ;;  %789 = vmatprep.mubr.bf16.mxu1 %v309_v46 }
 0x1d5   :  { %749 = vmatmul.mubr.bf16.vlgmr.msra.gmra.mxu0 %v308_v49  ;;  %790 = vmatmul.mubr.bf16.vlgmr.msra.gmra.mxu1 %v308_v49  ;;  %p1615_p1 = pnand %p1614_p0, %p1608_p11 }
 0x1d6   :  { %1289 = vmatpush3.bf16.msra.mxu0 %v1475_v47  ;;  %1311 = vmatpush3.bf16.msra.mxu1 %v1476_v48 }
 0x1d7   :  { %1290 = vmatprep.subr.bf16.mxu0 %v1477_v50  ;;  %1312 = vmatprep.subr.bf16.mxu1 %v1478_v51 }
 0x1da   :  { %1291 = vmatpush3.bf16.msra.mxu0 %v1479_v52  ;;  %1313 = vmatpush3.bf16.msra.mxu1 %v1480_v53 }
 0x1db   :  { %1292 = vmatprep.subr.bf16.mxu0 %v1481_v54  ;;  %1314 = vmatprep.subr.bf16.mxu1 %v1482_v55 }
 0x1de   :  { %1293 = vmatpush3.bf16.msra.mxu0 %v1483_v56  ;;  %1315 = vmatpush3.bf16.msra.mxu1 %v1484_v57 }
 0x1df   :  { %1294 = vmatprep.subr.bf16.mxu0 %v1485_v58  ;;  %1316 = vmatprep.subr.bf16.mxu1 %v1486_v59 }
 0x1e2   :  { %1295 = vmatpush3.bf16.msra.mxu0 %v1487_v60  ;;  %1317 = vmatpush3.bf16.msra.mxu1 %v1488_v61 }
 0x1e3   :  { %1296 = vmatprep.subr.bf16.mxu0 %v1489_v62  ;;  %1318 = vmatprep.subr.bf16.mxu1 %v1490_v63 }
 0x1e6   :  { %1297 = vmatpush3.bf16.msra.mxu0 %v1491_v0  ;;  %1319 = vmatpush3.bf16.msra.mxu1 %v1492_v1 }
 0x1e7   :  { %1298 = vmatprep.subr.bf16.mxu0 %v1493_v2  ;;  %1320 = vmatprep.subr.bf16.mxu1 %v1494_v3 }
 0x1ea   :  { %1299 = vmatpush3.bf16.msra.mxu0 %v1495_v4  ;;  %1321 = vmatpush3.bf16.msra.mxu1 %v1496_v5 }
 0x1eb   :  { %1300 = vmatprep.subr.bf16.mxu0 %v1497_v6  ;;  %1322 = vmatprep.subr.bf16.mxu1 %v1498_v7 }
 0x1ee   :  { %1301 = vmatpush3.bf16.msra.mxu0 %v1499_v8  ;;  %1323 = vmatpush3.bf16.msra.mxu1 %v1500_v9 }
 0x1ef   :  { %1302 = vmatprep.subr.bf16.mxu0 %v1501_v10  ;;  %1324 = vmatprep.subr.bf16.mxu1 %v1502_v11 }
 0x1f2   :  { %1303 = vmatpush3.bf16.msra.mxu0 %v1503_v12  ;;  %1325 = vmatpush3.bf16.msra.mxu1 %v1504_v13 }
 0x295   :  { %v750_v21 = vpop.f32.mrf.mxu0  ;;  %v791_v22 = vpop.f32.mrf.mxu1 }
 0x296   :  { %v751_v23 = vadd.f32 %v750_v21, %v379_v17  ;;  %v792_v24 = vadd.f32 %v791_v22, %v387_v18 }
 0x297   :  { %v752_v25 = vpop.f32.mrf.mxu0  ;;  %v793_v26 = vpop.f32.mrf.mxu1 }
 0x298   :  { %v753_v27 = vadd.f32 %v752_v25, %v383_v19  ;;  %v794_v28 = vadd.f32 %v793_v26, %v391_v20  ;;  %v798_v29 = vmax.f32 %v751_v23, 0.0  ;;  %v800_v30 = vmax.f32 %v792_v24, 0.0 }
 0x299   :  { %v754_v31 = vpop.f32.mrf.mxu0  ;;  %v795_v34 = vpop.f32.mrf.mxu1 }
 0x29a   :  { %v799_v36 = vmax.f32 %v753_v27, 0.0  ;;  %v801_v37 = vmax.f32 %v794_v28, 0.0  ;;  %v802_v35 = vpack.c.bf16 %v798_v29, %v798_v29  ;;  %v804_v40 = vpack.c.bf16 %v800_v30, %v800_v30 }
 0x29b   :  { %v755_v33 = vpop.f32.mrf.mxu0  ;;  %v796_v38 = vpop.f32.mrf.mxu1 }
 0x29c   :  { %v803_v39 = vpack.c.bf16 %v799_v36, %v799_v36  ;;  %v805_v32 = vpack.c.bf16 %v801_v37, %v801_v37 }
 0x29e   :  { %1101 = vmatprep.mubr.bf16.mxu0 %v803_v39  ;;  %1141 = vmatprep.mubr.bf16.mxu1 %v805_v32 }
 0x29f   :  { %1102 = vmatmul.mubr.bf16.vlgmr.msra.gmra.mxu0 %v802_v35  ;;  %1142 = vmatmul.mubr.bf16.vlgmr.msra.gmra.mxu1 %v804_v40 }
 0x35f   :  { %v1304_v41 = vpop.f32.mrf.mxu0  ;;  %v1326_v42 = vpop.f32.mrf.mxu1 }
 0x361   :  { %v1305_v44 = vpop.f32.mrf.mxu0  ;;  %v1327_v45 = vpop.f32.mrf.mxu1 }
 0x362   :  { %v1306_v46 = vadd.f32 %v1305_v44, %v1304_v41  ;;  %v1328_v50 = vadd.f32 %v1327_v45, %v1326_v42 }
 0x363   :  { %v1307_v47 = vpop.f32.mrf.mxu0  ;;  %v1329_v48 = vpop.f32.mrf.mxu1 }
 0x364   :  { %v1104_v49 = vadd.f32 %v1306_v46, %v1253_v43 }
 0x365   :  { %v1308_v51 = vpop.f32.mrf.mxu0  ;;  %v1330_v52 = vpop.f32.mrf.mxu1 }
 0x366   :  { %v1144_v53 = vadd.f32 %v1328_v50, %v1104_v49 }
 0x368   :  { %v1149_v54 = vmul.f32 0.5, %v1144_v53 }
 0x36a   :  { %1505 = vtanh.f32 %v1149_v54 }
 0x377   :  { %v1506_v55 = vpop.eup %1505 }
 0x378   :  { %v1151_v56 = vadd.f32 1.0, %v1506_v55 }
 0x37a   :  { %v1152_v57 = vmul.f32 0.5, %v1151_v56 }
 0x37c   :  { %1153 = vst [vmem:[#allocation11] sm:$0xff] %v1152_v57 }
 0x37d   :  { %1618 = shalt.err (!%p1615_p1)
}
 0x37e   :  { %1163 = dma.vmem_to_hbm [thread:$0]  %s1161_s20, 128, %s1753_s9, [#allocation4]  }
 0x37f   :  { %1633 = dma.done.wait [#allocation4], 128  }
 0x380   :  { %1634 = vsyncadd [#allocation4], 4294967168 }
 0x381   :  { %1167 = vsyncpa [#allocation3], 1 }
 0x382   :  { %1168 = vsyncpa [#allocation6], 1 }
 0x383   :  { %1169 = vsyncpa [#allocation9], 1 }
 0x384   :  { %1170 = vsyncpa [#allocation4], 1 }

</bundles_post_ra>
